<compile_context>
chip_gen: v5e
topology: v5e:2x2
jax: 0.10.0
libtpu: 0.0.40
codegen_flags: <defaults>
</compile_context>

<pallas_src>
import functools

import jax
import jax.numpy as jnp
from jax import lax
from jax.experimental import pallas as pl
from jax.experimental.pallas import tpu as pltpu


def _round_up(v, m):
    return (v + m - 1) // m * m


def _lstm_chunk_kernel(gx_ref, whh_ref, hseq_ref, cseq_ref, h_scr, c_scr,
                       *, chunk, hsp):
    """Runs `chunk` timesteps of the recurrence per grid step.

    gx_ref   : (chunk, Bs, 4*hsp)  precomputed x@W_ih + bias for this chunk/shard
    whh_ref  : (hsp, 4*hsp)        recurrent weights (grid-invariant)
    hseq_ref : (chunk, Bs, hsp)    hidden outputs for this chunk (time-major)
    cseq_ref : (chunk, Bs, hsp)    cell   outputs for this chunk (time-major)
    h_scr/c_scr : (Bs, hsp) f32    recurrent state, persists across the time axis
    """
    @pl.when(pl.program_id(1) == 0)
    def _():
        h_scr[...] = jnp.zeros_like(h_scr)
        c_scr[...] = jnp.zeros_like(c_scr)

    def step(t, carry):
        h_prev = h_scr[...]
        c_prev = c_scr[...]
        # Only the recurrent matmul remains on the serial critical path.
        gates = gx_ref[t] + jnp.dot(h_prev, whh_ref[...],
                                    preferred_element_type=jnp.float32)
        # hsp % 128 == 0, so every gate slice is 128-lane aligned.
        # i/f sigmoids fused into a single contiguous EUP slab.
        i_f = jax.nn.sigmoid(gates[:, : 2 * hsp])
        i_t = i_f[:, :hsp]
        f_t = i_f[:, hsp:]
        g_t = jnp.tanh(gates[:, 2 * hsp: 3 * hsp])
        o_t = jax.nn.sigmoid(gates[:, 3 * hsp:])

        pre_c_t = f_t * c_prev + i_t * g_t
        # Exactly mirrors the PyTorch code: tanh of the OLD cell state.
        pre_h_t = o_t * jnp.tanh(c_prev)

        h_scr[...] = pre_h_t
        c_scr[...] = pre_c_t
        hseq_ref[t] = pre_h_t
        cseq_ref[t] = pre_c_t
        return carry

    lax.fori_loop(0, chunk, step, 0, unroll=chunk <= 8)


def gaussian_lstm_core_forward(x, weight_ih, weight_hh, bias, init_states=None):
    """x: (batch, seq, input_sz) float32.

    Returns (hidden_seq, c_seq, (h_mus, h_stds), (c_mus, c_stds), (h_t, c_t))
    matching the PyTorch module (noise branch disabled -> Nones).
    """
    B, S, IN = x.shape
    HS = weight_hh.shape[0]
    assert weight_ih.shape == (IN, 4 * HS)
    assert weight_hh.shape == (HS, 4 * HS)
    assert bias.shape == (4 * HS,)
    # TODO(synk): non-zero init_states not plumbed into the kernel; default
    #             zero-init path only (matches module default).
    del init_states

    f32 = jnp.float32

    # ---- padding so gate slices / stores are (sublane=8, lane=128) aligned.
    HSp = _round_up(HS, 128)
    B8 = _round_up(B, 8)
    nb = 2 if B8 >= 16 else 1                 # batch shards (v7x: 1 per TensorCore)
    Bs = _round_up(-(-B8 // nb), 8)           # per-shard batch, sublane-aligned
    Bp = nb * Bs

    # ---- sequence chunking: amortize grid-step overhead within a VMEM budget.
    per_step_bytes = 2 * 6 * Bs * HSp * 4     # double-buffered gx + 2 output blocks
    T = int(max(1, min(S, (8 * 1024 * 1024) // per_step_bytes, 128)))
    Sp = _round_up(S, T)
    n_chunks = Sp // T

    # ---- pad weights per-gate so each gate block starts on a 128-lane boundary.
    wih_p = jnp.zeros((IN, 4, HSp), f32).at[:, :, :HS].set(
        weight_ih.astype(f32).reshape(IN, 4, HS)).reshape(IN, 4 * HSp)
    whh_p = jnp.zeros((HSp, 4, HSp), f32).at[:HS, :, :HS].set(
        weight_hh.astype(f32).reshape(HS, 4, HS)).reshape(HSp, 4 * HSp)
    bias_p = jnp.zeros((4, HSp), f32).at[:, :HS].set(
        bias.astype(f32).reshape(4, HS)).reshape(4 * HSp)

    # ---- hoisted input projection: one large MXU-saturating GEMM (plain XLA),
    #      producing time-major gates directly (no transpose of the big tensor).
    x_p = jnp.zeros((Bp, Sp, IN), f32).at[:B, :S, :].set(x.astype(f32))
    x_tm = jnp.transpose(x_p, (1, 0, 2))                       # (Sp, Bp, IN)
    gates_x = (x_tm.reshape(Sp * Bp, IN) @ wih_p + bias_p).reshape(Sp, Bp, 4 * HSp)

    kernel = functools.partial(_lstm_chunk_kernel, chunk=T, hsp=HSp)

    grid_spec = pltpu.PrefetchScalarGridSpec(
        num_scalar_prefetch=0,
        grid=(nb, n_chunks),
        in_specs=[
            pl.BlockSpec((T, Bs, 4 * HSp), lambda b, c: (c, b, 0)),   # gates_x chunk
            pl.BlockSpec((HSp, 4 * HSp), lambda b, c: (0, 0)),        # W_hh (invariant)
        ],
        out_specs=[
            pl.BlockSpec((T, Bs, HSp), lambda b, c: (c, b, 0)),       # hidden_seq
            pl.BlockSpec((T, Bs, HSp), lambda b, c: (c, b, 0)),       # c_seq
        ],
        scratch_shapes=[
            pltpu.VMEM((Bs, HSp), f32),                               # h state
            pltpu.VMEM((Bs, HSp), f32),                               # c state
        ],
    )

    hidden_tm, c_tm = pl.pallas_call(
        kernel,
        out_shape=(jax.ShapeDtypeStruct((Sp, Bp, HSp), f32),
                   jax.ShapeDtypeStruct((Sp, Bp, HSp), f32)),
        grid_spec=grid_spec,
        compiler_params=pltpu.CompilerParams(
            dimension_semantics=("parallel", "arbitrary"),
            vmem_limit_bytes=32 * 1024 * 1024),
    )(gates_x, whh_p)

    hidden_seq = jnp.transpose(hidden_tm[:S, :B, :HS], (1, 0, 2))   # (B, S, HS)
    c_seq = jnp.transpose(c_tm[:S, :B, :HS], (1, 0, 2))             # (B, S, HS)
    h_t = hidden_seq[:, -1, :]
    c_t = c_seq[:, -1, :]
    return hidden_seq, c_seq, (None, None), (None, None), (h_t, c_t)


def _reference_forward(x, weight_ih, weight_hh, bias):
    """Pure-JAX reference that mirrors the PyTorch loop exactly."""
    B, S, IN = x.shape
    HS = weight_hh.shape[0]
    h = jnp.zeros((B, HS), jnp.float32)
    c = jnp.zeros((B, HS), jnp.float32)
    hs, cs = [], []
    for t in range(S):
        x_t = x[:, t, :]
        gates = x_t @ weight_ih + h @ weight_hh + bias
        i_t = jax.nn.sigmoid(gates[:, :HS])
        f_t = jax.nn.sigmoid(gates[:, HS:2 * HS])
        g_t = jnp.tanh(gates[:, 2 * HS:3 * HS])
        o_t = jax.nn.sigmoid(gates[:, 3 * HS:])
        pre_c = f_t * c + i_t * g_t
        pre_h = o_t * jnp.tanh(c)            # tanh of OLD c, as in the module
        h, c = pre_h, pre_c
        hs.append(h)
        cs.append(c)
    return jnp.stack(hs, axis=1), jnp.stack(cs, axis=1), h, c


def _xavier_uniform(key, shape):
    fan_in, fan_out = shape
    limit = (6.0 / (fan_in + fan_out)) ** 0.5
    return jax.random.uniform(key, shape, jnp.float32, -limit, limit)


if __name__ == "__main__":
    # Small, module-consistent shapes: (batch, seq, feature)
    B, S, IN, HS = 2, 8, 4, 32

    key = jax.random.PRNGKey(0)
    k_x, k_ih, k_hh = jax.random.split(key, 3)

    x = jax.random.normal(k_x, (B, S, IN), jnp.float32)
    weight_ih = _xavier_uniform(k_ih, (IN, 4 * HS))
    weight_hh = _xavier_uniform(k_hh, (HS, 4 * HS))
    bias = jnp.zeros((4 * HS,), jnp.float32)   # nn.init.zeros_ for 1-D params

    hidden_seq, c_seq, _, _, (h_t, c_t) = gaussian_lstm_core_forward(
        x, weight_ih, weight_hh, bias)
    jax.block_until_ready((hidden_seq, c_seq, h_t, c_t))

    ref_h, ref_c, ref_hf, ref_cf = _reference_forward(x, weight_ih, weight_hh, bias)
    assert jnp.allclose(hidden_seq, ref_h, atol=1e-5, rtol=1e-5)
    assert jnp.allclose(c_seq, ref_c, atol=1e-5, rtol=1e-5)
    assert jnp.allclose(h_t, ref_hf, atol=1e-5, rtol=1e-5)
    assert jnp.allclose(c_t, ref_cf, atol=1e-5, rtol=1e-5)

    print("KERNEL_OK")
</pallas_src>

<mosaic_0001>
module attributes {stable_mosaic.version = 11 : i64} {
  func.func @_lstm_chunk_kernel(%arg0: i32, %arg1: i32, %arg2: memref<8x8x512xf32, #tpu.memory_space<vmem>>, %arg3: memref<128x512xf32, #tpu.memory_space<vmem>>, %arg4: memref<8x8x128xf32, #tpu.memory_space<vmem>>, %arg5: memref<8x8x128xf32, #tpu.memory_space<vmem>>, %arg6: memref<8x128xf32, #tpu.memory_space<vmem>>, %arg7: memref<8x128xf32, #tpu.memory_space<vmem>>) attributes {dimension_semantics = [#tpu.dimension_semantics<parallel>, #tpu.dimension_semantics<arbitrary>], iteration_bounds = array<i64: 1, 1>, scalar_prefetch = 0 : i64, scratch_operands = 2 : i64, tpu.core_type = #tpu.core_type<tc>, window_params = [{transform_indices = @transform_0, window_bounds = array<i64: 8, 8, 512>}, {pipeline_mode = #tpu.pipeline_mode<synchronous>, transform_indices = @transform_1, window_bounds = array<i64: 128, 512>}, {transform_indices = @transform_2, window_bounds = array<i64: 8, 8, 128>}, {transform_indices = @transform_3, window_bounds = array<i64: 8, 8, 128>}]} {
    %c0_i32 = arith.constant 0 : i32
    %0 = arith.cmpi eq, %arg1, %c0_i32 : i32
    %1 = arith.extui %0 : i1 to i32
    %c0_i32_0 = arith.constant 0 : i32
    %2 = arith.cmpi ne, %1, %c0_i32_0 : i32
    scf.if %2 {
      %cst_152 = arith.constant 0.000000e+00 : f32
      %315 = vector.broadcast %cst_152 : f32 to vector<8x128xf32>
      %c0_153 = arith.constant 0 : index
      %c0_154 = arith.constant 0 : index
      %316 = vector.load %arg6[%c0_153, %c0_154] : memref<8x128xf32, #tpu.memory_space<vmem>>, vector<8x128xf32>
      tpu.vector_store %arg6[%c0_153, %c0_154], %315 {strides = array<i32>} : memref<8x128xf32, #tpu.memory_space<vmem>>, vector<8x128xf32>,
      %cst_155 = arith.constant 0.000000e+00 : f32
      %317 = vector.broadcast %cst_155 : f32 to vector<8x128xf32>
      %c0_156 = arith.constant 0 : index
      %c0_157 = arith.constant 0 : index
      %318 = vector.load %arg7[%c0_156, %c0_157] : memref<8x128xf32, #tpu.memory_space<vmem>>, vector<8x128xf32>
      tpu.vector_store %arg7[%c0_156, %c0_157], %317 {strides = array<i32>} : memref<8x128xf32, #tpu.memory_space<vmem>>, vector<8x128xf32>,
    } else {
    }
    %c0_i32_1 = arith.constant 0 : i32
    %c0 = arith.constant 0 : index
    %c0_2 = arith.constant 0 : index
    %3 = vector.load %arg6[%c0, %c0_2] : memref<8x128xf32, #tpu.memory_space<vmem>>, vector<8x128xf32>
    %c0_3 = arith.constant 0 : index
    %c0_4 = arith.constant 0 : index
    %4 = vector.load %arg7[%c0_3, %c0_4] : memref<8x128xf32, #tpu.memory_space<vmem>>, vector<8x128xf32>
    %5 = arith.index_cast %c0_i32_1 : i32 to index
    %c0_5 = arith.constant 0 : index
    %c0_6 = arith.constant 0 : index
    %6 = vector.load %arg2[%5, %c0_5, %c0_6] : memref<8x8x512xf32, #tpu.memory_space<vmem>>, vector<1x8x512xf32>
    %7 = vector.shape_cast %6 : vector<1x8x512xf32> to vector<8x512xf32>
    %c0_7 = arith.constant 0 : index
    %c0_8 = arith.constant 0 : index
    %8 = vector.load %arg3[%c0_7, %c0_8] : memref<128x512xf32, #tpu.memory_space<vmem>>, vector<128x512xf32>
    %cst = arith.constant dense<0.000000e+00> : vector<8x512xf32>
    %9 = tpu.matmul %3, %8, %cst {dimension_numbers = #tpu.dot_dimension_numbers<[1], [0], [0], [1], [0, 0, 1, 1], [], []>} : vector<8x128xf32>, vector<128x512xf32>, vector<8x512xf32> -> vector<8x512xf32>
    %10 = arith.addf %7, %9 : vector<8x512xf32>
    %11 = vector.extract_strided_slice %10 {offsets = [0, 0], sizes = [8, 256], strides = [1, 1]} : vector<8x512xf32> to vector<8x256xf32>
    %12 = arith.negf %11 : vector<8x256xf32>
    %13 = math.exp %12 : vector<8x256xf32>
    %cst_9 = arith.constant 1.000000e+00 : f32
    %14 = vector.broadcast %cst_9 : f32 to vector<8x256xf32>
    %15 = arith.addf %14, %13 : vector<8x256xf32>
    %16 = arith.divf %14, %15 : vector<8x256xf32>
    %17 = vector.extract_strided_slice %16 {offsets = [0, 0], sizes = [8, 128], strides = [1, 1]} : vector<8x256xf32> to vector<8x128xf32>
    %18 = vector.extract_strided_slice %16 {offsets = [0, 128], sizes = [8, 128], strides = [1, 1]} : vector<8x256xf32> to vector<8x128xf32>
    %19 = vector.extract_strided_slice %10 {offsets = [0, 256], sizes = [8, 128], strides = [1, 1]} : vector<8x512xf32> to vector<8x128xf32>
    %20 = math.tanh %19 : vector<8x128xf32>
    %21 = vector.extract_strided_slice %10 {offsets = [0, 384], sizes = [8, 128], strides = [1, 1]} : vector<8x512xf32> to vector<8x128xf32>
    %22 = arith.negf %21 : vector<8x128xf32>
    %23 = math.exp %22 : vector<8x128xf32>
    %cst_10 = arith.constant 1.000000e+00 : f32
    %24 = vector.broadcast %cst_10 : f32 to vector<8x128xf32>
    %25 = arith.addf %24, %23 : vector<8x128xf32>
    %26 = arith.divf %24, %25 : vector<8x128xf32>
    %27 = arith.mulf %18, %4 : vector<8x128xf32>
    %28 = arith.mulf %17, %20 : vector<8x128xf32>
    %29 = arith.addf %27, %28 : vector<8x128xf32>
    %30 = math.tanh %4 : vector<8x128xf32>
    %31 = arith.mulf %26, %30 : vector<8x128xf32>
    %c0_11 = arith.constant 0 : index
    %c0_12 = arith.constant 0 : index
    %32 = vector.load %arg6[%c0_11, %c0_12] : memref<8x128xf32, #tpu.memory_space<vmem>>, vector<8x128xf32>
    tpu.vector_store %arg6[%c0_11, %c0_12], %31 {strides = array<i32>} : memref<8x128xf32, #tpu.memory_space<vmem>>, vector<8x128xf32>,
    %c0_13 = arith.constant 0 : index
    %c0_14 = arith.constant 0 : index
    %33 = vector.load %arg7[%c0_13, %c0_14] : memref<8x128xf32, #tpu.memory_space<vmem>>, vector<8x128xf32>
    tpu.vector_store %arg7[%c0_13, %c0_14], %29 {strides = array<i32>} : memref<8x128xf32, #tpu.memory_space<vmem>>, vector<8x128xf32>,
    %34 = arith.index_cast %c0_i32_1 : i32 to index
    %c0_15 = arith.constant 0 : index
    %c0_16 = arith.constant 0 : index
    %35 = vector.load %arg4[%34, %c0_15, %c0_16] : memref<8x8x128xf32, #tpu.memory_space<vmem>>, vector<1x8x128xf32>
    %36 = vector.shape_cast %35 : vector<1x8x128xf32> to vector<8x128xf32>
    %37 = vector.shape_cast %31 : vector<8x128xf32> to vector<1x8x128xf32>
    tpu.vector_store %arg4[%34, %c0_15, %c0_16], %37 {strides = array<i32>} : memref<8x8x128xf32, #tpu.memory_space<vmem>>, vector<1x8x128xf32>,
    %38 = arith.index_cast %c0_i32_1 : i32 to index
    %c0_17 = arith.constant 0 : index
    %c0_18 = arith.constant 0 : index
    %39 = vector.load %arg5[%38, %c0_17, %c0_18] : memref<8x8x128xf32, #tpu.memory_space<vmem>>, vector<1x8x128xf32>
    %40 = vector.shape_cast %39 : vector<1x8x128xf32> to vector<8x128xf32>
    %41 = vector.shape_cast %29 : vector<8x128xf32> to vector<1x8x128xf32>
    tpu.vector_store %arg5[%38, %c0_17, %c0_18], %41 {strides = array<i32>} : memref<8x8x128xf32, #tpu.memory_space<vmem>>, vector<1x8x128xf32>,
    %c1_i32 = arith.constant 1 : i32
    %c0_19 = arith.constant 0 : index
    %c0_20 = arith.constant 0 : index
    %42 = vector.load %arg6[%c0_19, %c0_20] : memref<8x128xf32, #tpu.memory_space<vmem>>, vector<8x128xf32>
    %c0_21 = arith.constant 0 : index
    %c0_22 = arith.constant 0 : index
    %43 = vector.load %arg7[%c0_21, %c0_22] : memref<8x128xf32, #tpu.memory_space<vmem>>, vector<8x128xf32>
    %44 = arith.index_cast %c1_i32 : i32 to index
    %c0_23 = arith.constant 0 : index
    %c0_24 = arith.constant 0 : index
    %45 = vector.load %arg2[%44, %c0_23, %c0_24] : memref<8x8x512xf32, #tpu.memory_space<vmem>>, vector<1x8x512xf32>
    %46 = vector.shape_cast %45 : vector<1x8x512xf32> to vector<8x512xf32>
    %c0_25 = arith.constant 0 : index
    %c0_26 = arith.constant 0 : index
    %47 = vector.load %arg3[%c0_25, %c0_26] : memref<128x512xf32, #tpu.memory_space<vmem>>, vector<128x512xf32>
    %cst_27 = arith.constant dense<0.000000e+00> : vector<8x512xf32>
    %48 = tpu.matmul %42, %47, %cst_27 {dimension_numbers = #tpu.dot_dimension_numbers<[1], [0], [0], [1], [0, 0, 1, 1], [], []>} : vector<8x128xf32>, vector<128x512xf32>, vector<8x512xf32> -> vector<8x512xf32>
    %49 = arith.addf %46, %48 : vector<8x512xf32>
    %50 = vector.extract_strided_slice %49 {offsets = [0, 0], sizes = [8, 256], strides = [1, 1]} : vector<8x512xf32> to vector<8x256xf32>
    %51 = arith.negf %50 : vector<8x256xf32>
    %52 = math.exp %51 : vector<8x256xf32>
    %cst_28 = arith.constant 1.000000e+00 : f32
    %53 = vector.broadcast %cst_28 : f32 to vector<8x256xf32>
    %54 = arith.addf %53, %52 : vector<8x256xf32>
    %55 = arith.divf %53, %54 : vector<8x256xf32>
    %56 = vector.extract_strided_slice %55 {offsets = [0, 0], sizes = [8, 128], strides = [1, 1]} : vector<8x256xf32> to vector<8x128xf32>
    %57 = vector.extract_strided_slice %55 {offsets = [0, 128], sizes = [8, 128], strides = [1, 1]} : vector<8x256xf32> to vector<8x128xf32>
    %58 = vector.extract_strided_slice %49 {offsets = [0, 256], sizes = [8, 128], strides = [1, 1]} : vector<8x512xf32> to vector<8x128xf32>
    %59 = math.tanh %58 : vector<8x128xf32>
    %60 = vector.extract_strided_slice %49 {offsets = [0, 384], sizes = [8, 128], strides = [1, 1]} : vector<8x512xf32> to vector<8x128xf32>
    %61 = arith.negf %60 : vector<8x128xf32>
    %62 = math.exp %61 : vector<8x128xf32>
    %cst_29 = arith.constant 1.000000e+00 : f32
    %63 = vector.broadcast %cst_29 : f32 to vector<8x128xf32>
    %64 = arith.addf %63, %62 : vector<8x128xf32>
    %65 = arith.divf %63, %64 : vector<8x128xf32>
    %66 = arith.mulf %57, %43 : vector<8x128xf32>
    %67 = arith.mulf %56, %59 : vector<8x128xf32>
    %68 = arith.addf %66, %67 : vector<8x128xf32>
    %69 = math.tanh %43 : vector<8x128xf32>
    %70 = arith.mulf %65, %69 : vector<8x128xf32>
    %c0_30 = arith.constant 0 : index
    %c0_31 = arith.constant 0 : index
    %71 = vector.load %arg6[%c0_30, %c0_31] : memref<8x128xf32, #tpu.memory_space<vmem>>, vector<8x128xf32>
    tpu.vector_store %arg6[%c0_30, %c0_31], %70 {strides = array<i32>} : memref<8x128xf32, #tpu.memory_space<vmem>>, vector<8x128xf32>,
    %c0_32 = arith.constant 0 : index
    %c0_33 = arith.constant 0 : index
    %72 = vector.load %arg7[%c0_32, %c0_33] : memref<8x128xf32, #tpu.memory_space<vmem>>, vector<8x128xf32>
    tpu.vector_store %arg7[%c0_32, %c0_33], %68 {strides = array<i32>} : memref<8x128xf32, #tpu.memory_space<vmem>>, vector<8x128xf32>,
    %73 = arith.index_cast %c1_i32 : i32 to index
    %c0_34 = arith.constant 0 : index
    %c0_35 = arith.constant 0 : index
    %74 = vector.load %arg4[%73, %c0_34, %c0_35] : memref<8x8x128xf32, #tpu.memory_space<vmem>>, vector<1x8x128xf32>
    %75 = vector.shape_cast %74 : vector<1x8x128xf32> to vector<8x128xf32>
    %76 = vector.shape_cast %70 : vector<8x128xf32> to vector<1x8x128xf32>
    tpu.vector_store %arg4[%73, %c0_34, %c0_35], %76 {strides = array<i32>} : memref<8x8x128xf32, #tpu.memory_space<vmem>>, vector<1x8x128xf32>,
    %77 = arith.index_cast %c1_i32 : i32 to index
    %c0_36 = arith.constant 0 : index
    %c0_37 = arith.constant 0 : index
    %78 = vector.load %arg5[%77, %c0_36, %c0_37] : memref<8x8x128xf32, #tpu.memory_space<vmem>>, vector<1x8x128xf32>
    %79 = vector.shape_cast %78 : vector<1x8x128xf32> to vector<8x128xf32>
    %80 = vector.shape_cast %68 : vector<8x128xf32> to vector<1x8x128xf32>
    tpu.vector_store %arg5[%77, %c0_36, %c0_37], %80 {strides = array<i32>} : memref<8x8x128xf32, #tpu.memory_space<vmem>>, vector<1x8x128xf32>,
    %c2_i32 = arith.constant 2 : i32
    %c0_38 = arith.constant 0 : index
    %c0_39 = arith.constant 0 : index
    %81 = vector.load %arg6[%c0_38, %c0_39] : memref<8x128xf32, #tpu.memory_space<vmem>>, vector<8x128xf32>
    %c0_40 = arith.constant 0 : index
    %c0_41 = arith.constant 0 : index
    %82 = vector.load %arg7[%c0_40, %c0_41] : memref<8x128xf32, #tpu.memory_space<vmem>>, vector<8x128xf32>
    %83 = arith.index_cast %c2_i32 : i32 to index
    %c0_42 = arith.constant 0 : index
    %c0_43 = arith.constant 0 : index
    %84 = vector.load %arg2[%83, %c0_42, %c0_43] : memref<8x8x512xf32, #tpu.memory_space<vmem>>, vector<1x8x512xf32>
    %85 = vector.shape_cast %84 : vector<1x8x512xf32> to vector<8x512xf32>
    %c0_44 = arith.constant 0 : index
    %c0_45 = arith.constant 0 : index
    %86 = vector.load %arg3[%c0_44, %c0_45] : memref<128x512xf32, #tpu.memory_space<vmem>>, vector<128x512xf32>
    %cst_46 = arith.constant dense<0.000000e+00> : vector<8x512xf32>
    %87 = tpu.matmul %81, %86, %cst_46 {dimension_numbers = #tpu.dot_dimension_numbers<[1], [0], [0], [1], [0, 0, 1, 1], [], []>} : vector<8x128xf32>, vector<128x512xf32>, vector<8x512xf32> -> vector<8x512xf32>
    %88 = arith.addf %85, %87 : vector<8x512xf32>
    %89 = vector.extract_strided_slice %88 {offsets = [0, 0], sizes = [8, 256], strides = [1, 1]} : vector<8x512xf32> to vector<8x256xf32>
    %90 = arith.negf %89 : vector<8x256xf32>
    %91 = math.exp %90 : vector<8x256xf32>
    %cst_47 = arith.constant 1.000000e+00 : f32
    %92 = vector.broadcast %cst_47 : f32 to vector<8x256xf32>
    %93 = arith.addf %92, %91 : vector<8x256xf32>
    %94 = arith.divf %92, %93 : vector<8x256xf32>
    %95 = vector.extract_strided_slice %94 {offsets = [0, 0], sizes = [8, 128], strides = [1, 1]} : vector<8x256xf32> to vector<8x128xf32>
    %96 = vector.extract_strided_slice %94 {offsets = [0, 128], sizes = [8, 128], strides = [1, 1]} : vector<8x256xf32> to vector<8x128xf32>
    %97 = vector.extract_strided_slice %88 {offsets = [0, 256], sizes = [8, 128], strides = [1, 1]} : vector<8x512xf32> to vector<8x128xf32>
    %98 = math.tanh %97 : vector<8x128xf32>
    %99 = vector.extract_strided_slice %88 {offsets = [0, 384], sizes = [8, 128], strides = [1, 1]} : vector<8x512xf32> to vector<8x128xf32>
    %100 = arith.negf %99 : vector<8x128xf32>
    %101 = math.exp %100 : vector<8x128xf32>
    %cst_48 = arith.constant 1.000000e+00 : f32
    %102 = vector.broadcast %cst_48 : f32 to vector<8x128xf32>
    %103 = arith.addf %102, %101 : vector<8x128xf32>
    %104 = arith.divf %102, %103 : vector<8x128xf32>
    %105 = arith.mulf %96, %82 : vector<8x128xf32>
    %106 = arith.mulf %95, %98 : vector<8x128xf32>
    %107 = arith.addf %105, %106 : vector<8x128xf32>
    %108 = math.tanh %82 : vector<8x128xf32>
    %109 = arith.mulf %104, %108 : vector<8x128xf32>
    %c0_49 = arith.constant 0 : index
    %c0_50 = arith.constant 0 : index
    %110 = vector.load %arg6[%c0_49, %c0_50] : memref<8x128xf32, #tpu.memory_space<vmem>>, vector<8x128xf32>
    tpu.vector_store %arg6[%c0_49, %c0_50], %109 {strides = array<i32>} : memref<8x128xf32, #tpu.memory_space<vmem>>, vector<8x128xf32>,
    %c0_51 = arith.constant 0 : index
    %c0_52 = arith.constant 0 : index
    %111 = vector.load %arg7[%c0_51, %c0_52] : memref<8x128xf32, #tpu.memory_space<vmem>>, vector<8x128xf32>
    tpu.vector_store %arg7[%c0_51, %c0_52], %107 {strides = array<i32>} : memref<8x128xf32, #tpu.memory_space<vmem>>, vector<8x128xf32>,
    %112 = arith.index_cast %c2_i32 : i32 to index
    %c0_53 = arith.constant 0 : index
    %c0_54 = arith.constant 0 : index
    %113 = vector.load %arg4[%112, %c0_53, %c0_54] : memref<8x8x128xf32, #tpu.memory_space<vmem>>, vector<1x8x128xf32>
    %114 = vector.shape_cast %113 : vector<1x8x128xf32> to vector<8x128xf32>
    %115 = vector.shape_cast %109 : vector<8x128xf32> to vector<1x8x128xf32>
    tpu.vector_store %arg4[%112, %c0_53, %c0_54], %115 {strides = array<i32>} : memref<8x8x128xf32, #tpu.memory_space<vmem>>, vector<1x8x128xf32>,
    %116 = arith.index_cast %c2_i32 : i32 to index
    %c0_55 = arith.constant 0 : index
    %c0_56 = arith.constant 0 : index
    %117 = vector.load %arg5[%116, %c0_55, %c0_56] : memref<8x8x128xf32, #tpu.memory_space<vmem>>, vector<1x8x128xf32>
    %118 = vector.shape_cast %117 : vector<1x8x128xf32> to vector<8x128xf32>
    %119 = vector.shape_cast %107 : vector<8x128xf32> to vector<1x8x128xf32>
    tpu.vector_store %arg5[%116, %c0_55, %c0_56], %119 {strides = array<i32>} : memref<8x8x128xf32, #tpu.memory_space<vmem>>, vector<1x8x128xf32>,
    %c3_i32 = arith.constant 3 : i32
    %c0_57 = arith.constant 0 : index
    %c0_58 = arith.constant 0 : index
    %120 = vector.load %arg6[%c0_57, %c0_58] : memref<8x128xf32, #tpu.memory_space<vmem>>, vector<8x128xf32>
    %c0_59 = arith.constant 0 : index
    %c0_60 = arith.constant 0 : index
    %121 = vector.load %arg7[%c0_59, %c0_60] : memref<8x128xf32, #tpu.memory_space<vmem>>, vector<8x128xf32>
    %122 = arith.index_cast %c3_i32 : i32 to index
    %c0_61 = arith.constant 0 : index
    %c0_62 = arith.constant 0 : index
    %123 = vector.load %arg2[%122, %c0_61, %c0_62] : memref<8x8x512xf32, #tpu.memory_space<vmem>>, vector<1x8x512xf32>
    %124 = vector.shape_cast %123 : vector<1x8x512xf32> to vector<8x512xf32>
    %c0_63 = arith.constant 0 : index
    %c0_64 = arith.constant 0 : index
    %125 = vector.load %arg3[%c0_63, %c0_64] : memref<128x512xf32, #tpu.memory_space<vmem>>, vector<128x512xf32>
    %cst_65 = arith.constant dense<0.000000e+00> : vector<8x512xf32>
    %126 = tpu.matmul %120, %125, %cst_65 {dimension_numbers = #tpu.dot_dimension_numbers<[1], [0], [0], [1], [0, 0, 1, 1], [], []>} : vector<8x128xf32>, vector<128x512xf32>, vector<8x512xf32> -> vector<8x512xf32>
    %127 = arith.addf %124, %126 : vector<8x512xf32>
    %128 = vector.extract_strided_slice %127 {offsets = [0, 0], sizes = [8, 256], strides = [1, 1]} : vector<8x512xf32> to vector<8x256xf32>
    %129 = arith.negf %128 : vector<8x256xf32>
    %130 = math.exp %129 : vector<8x256xf32>
    %cst_66 = arith.constant 1.000000e+00 : f32
    %131 = vector.broadcast %cst_66 : f32 to vector<8x256xf32>
    %132 = arith.addf %131, %130 : vector<8x256xf32>
    %133 = arith.divf %131, %132 : vector<8x256xf32>
    %134 = vector.extract_strided_slice %133 {offsets = [0, 0], sizes = [8, 128], strides = [1, 1]} : vector<8x256xf32> to vector<8x128xf32>
    %135 = vector.extract_strided_slice %133 {offsets = [0, 128], sizes = [8, 128], strides = [1, 1]} : vector<8x256xf32> to vector<8x128xf32>
    %136 = vector.extract_strided_slice %127 {offsets = [0, 256], sizes = [8, 128], strides = [1, 1]} : vector<8x512xf32> to vector<8x128xf32>
    %137 = math.tanh %136 : vector<8x128xf32>
    %138 = vector.extract_strided_slice %127 {offsets = [0, 384], sizes = [8, 128], strides = [1, 1]} : vector<8x512xf32> to vector<8x128xf32>
    %139 = arith.negf %138 : vector<8x128xf32>
    %140 = math.exp %139 : vector<8x128xf32>
    %cst_67 = arith.constant 1.000000e+00 : f32
    %141 = vector.broadcast %cst_67 : f32 to vector<8x128xf32>
    %142 = arith.addf %141, %140 : vector<8x128xf32>
    %143 = arith.divf %141, %142 : vector<8x128xf32>
    %144 = arith.mulf %135, %121 : vector<8x128xf32>
    %145 = arith.mulf %134, %137 : vector<8x128xf32>
    %146 = arith.addf %144, %145 : vector<8x128xf32>
    %147 = math.tanh %121 : vector<8x128xf32>
    %148 = arith.mulf %143, %147 : vector<8x128xf32>
    %c0_68 = arith.constant 0 : index
    %c0_69 = arith.constant 0 : index
    %149 = vector.load %arg6[%c0_68, %c0_69] : memref<8x128xf32, #tpu.memory_space<vmem>>, vector<8x128xf32>
    tpu.vector_store %arg6[%c0_68, %c0_69], %148 {strides = array<i32>} : memref<8x128xf32, #tpu.memory_space<vmem>>, vector<8x128xf32>,
    %c0_70 = arith.constant 0 : index
    %c0_71 = arith.constant 0 : index
    %150 = vector.load %arg7[%c0_70, %c0_71] : memref<8x128xf32, #tpu.memory_space<vmem>>, vector<8x128xf32>
    tpu.vector_store %arg7[%c0_70, %c0_71], %146 {strides = array<i32>} : memref<8x128xf32, #tpu.memory_space<vmem>>, vector<8x128xf32>,
    %151 = arith.index_cast %c3_i32 : i32 to index
    %c0_72 = arith.constant 0 : index
    %c0_73 = arith.constant 0 : index
    %152 = vector.load %arg4[%151, %c0_72, %c0_73] : memref<8x8x128xf32, #tpu.memory_space<vmem>>, vector<1x8x128xf32>
    %153 = vector.shape_cast %152 : vector<1x8x128xf32> to vector<8x128xf32>
    %154 = vector.shape_cast %148 : vector<8x128xf32> to vector<1x8x128xf32>
    tpu.vector_store %arg4[%151, %c0_72, %c0_73], %154 {strides = array<i32>} : memref<8x8x128xf32, #tpu.memory_space<vmem>>, vector<1x8x128xf32>,
    %155 = arith.index_cast %c3_i32 : i32 to index
    %c0_74 = arith.constant 0 : index
    %c0_75 = arith.constant 0 : index
    %156 = vector.load %arg5[%155, %c0_74, %c0_75] : memref<8x8x128xf32, #tpu.memory_space<vmem>>, vector<1x8x128xf32>
    %157 = vector.shape_cast %156 : vector<1x8x128xf32> to vector<8x128xf32>
    %158 = vector.shape_cast %146 : vector<8x128xf32> to vector<1x8x128xf32>
    tpu.vector_store %arg5[%155, %c0_74, %c0_75], %158 {strides = array<i32>} : memref<8x8x128xf32, #tpu.memory_space<vmem>>, vector<1x8x128xf32>,
    %c4_i32 = arith.constant 4 : i32
    %c0_76 = arith.constant 0 : index
    %c0_77 = arith.constant 0 : index
    %159 = vector.load %arg6[%c0_76, %c0_77] : memref<8x128xf32, #tpu.memory_space<vmem>>, vector<8x128xf32>
    %c0_78 = arith.constant 0 : index
    %c0_79 = arith.constant 0 : index
    %160 = vector.load %arg7[%c0_78, %c0_79] : memref<8x128xf32, #tpu.memory_space<vmem>>, vector<8x128xf32>
    %161 = arith.index_cast %c4_i32 : i32 to index
    %c0_80 = arith.constant 0 : index
    %c0_81 = arith.constant 0 : index
    %162 = vector.load %arg2[%161, %c0_80, %c0_81] : memref<8x8x512xf32, #tpu.memory_space<vmem>>, vector<1x8x512xf32>
    %163 = vector.shape_cast %162 : vector<1x8x512xf32> to vector<8x512xf32>
    %c0_82 = arith.constant 0 : index
    %c0_83 = arith.constant 0 : index
    %164 = vector.load %arg3[%c0_82, %c0_83] : memref<128x512xf32, #tpu.memory_space<vmem>>, vector<128x512xf32>
    %cst_84 = arith.constant dense<0.000000e+00> : vector<8x512xf32>
    %165 = tpu.matmul %159, %164, %cst_84 {dimension_numbers = #tpu.dot_dimension_numbers<[1], [0], [0], [1], [0, 0, 1, 1], [], []>} : vector<8x128xf32>, vector<128x512xf32>, vector<8x512xf32> -> vector<8x512xf32>
    %166 = arith.addf %163, %165 : vector<8x512xf32>
    %167 = vector.extract_strided_slice %166 {offsets = [0, 0], sizes = [8, 256], strides = [1, 1]} : vector<8x512xf32> to vector<8x256xf32>
    %168 = arith.negf %167 : vector<8x256xf32>
    %169 = math.exp %168 : vector<8x256xf32>
    %cst_85 = arith.constant 1.000000e+00 : f32
    %170 = vector.broadcast %cst_85 : f32 to vector<8x256xf32>
    %171 = arith.addf %170, %169 : vector<8x256xf32>
    %172 = arith.divf %170, %171 : vector<8x256xf32>
    %173 = vector.extract_strided_slice %172 {offsets = [0, 0], sizes = [8, 128], strides = [1, 1]} : vector<8x256xf32> to vector<8x128xf32>
    %174 = vector.extract_strided_slice %172 {offsets = [0, 128], sizes = [8, 128], strides = [1, 1]} : vector<8x256xf32> to vector<8x128xf32>
    %175 = vector.extract_strided_slice %166 {offsets = [0, 256], sizes = [8, 128], strides = [1, 1]} : vector<8x512xf32> to vector<8x128xf32>
    %176 = math.tanh %175 : vector<8x128xf32>
    %177 = vector.extract_strided_slice %166 {offsets = [0, 384], sizes = [8, 128], strides = [1, 1]} : vector<8x512xf32> to vector<8x128xf32>
    %178 = arith.negf %177 : vector<8x128xf32>
    %179 = math.exp %178 : vector<8x128xf32>
    %cst_86 = arith.constant 1.000000e+00 : f32
    %180 = vector.broadcast %cst_86 : f32 to vector<8x128xf32>
    %181 = arith.addf %180, %179 : vector<8x128xf32>
    %182 = arith.divf %180, %181 : vector<8x128xf32>
    %183 = arith.mulf %174, %160 : vector<8x128xf32>
    %184 = arith.mulf %173, %176 : vector<8x128xf32>
    %185 = arith.addf %183, %184 : vector<8x128xf32>
    %186 = math.tanh %160 : vector<8x128xf32>
    %187 = arith.mulf %182, %186 : vector<8x128xf32>
    %c0_87 = arith.constant 0 : index
    %c0_88 = arith.constant 0 : index
    %188 = vector.load %arg6[%c0_87, %c0_88] : memref<8x128xf32, #tpu.memory_space<vmem>>, vector<8x128xf32>
    tpu.vector_store %arg6[%c0_87, %c0_88], %187 {strides = array<i32>} : memref<8x128xf32, #tpu.memory_space<vmem>>, vector<8x128xf32>,
    %c0_89 = arith.constant 0 : index
    %c0_90 = arith.constant 0 : index
    %189 = vector.load %arg7[%c0_89, %c0_90] : memref<8x128xf32, #tpu.memory_space<vmem>>, vector<8x128xf32>
    tpu.vector_store %arg7[%c0_89, %c0_90], %185 {strides = array<i32>} : memref<8x128xf32, #tpu.memory_space<vmem>>, vector<8x128xf32>,
    %190 = arith.index_cast %c4_i32 : i32 to index
    %c0_91 = arith.constant 0 : index
    %c0_92 = arith.constant 0 : index
    %191 = vector.load %arg4[%190, %c0_91, %c0_92] : memref<8x8x128xf32, #tpu.memory_space<vmem>>, vector<1x8x128xf32>
    %192 = vector.shape_cast %191 : vector<1x8x128xf32> to vector<8x128xf32>
    %193 = vector.shape_cast %187 : vector<8x128xf32> to vector<1x8x128xf32>
    tpu.vector_store %arg4[%190, %c0_91, %c0_92], %193 {strides = array<i32>} : memref<8x8x128xf32, #tpu.memory_space<vmem>>, vector<1x8x128xf32>,
    %194 = arith.index_cast %c4_i32 : i32 to index
    %c0_93 = arith.constant 0 : index
    %c0_94 = arith.constant 0 : index
    %195 = vector.load %arg5[%194, %c0_93, %c0_94] : memref<8x8x128xf32, #tpu.memory_space<vmem>>, vector<1x8x128xf32>
    %196 = vector.shape_cast %195 : vector<1x8x128xf32> to vector<8x128xf32>
    %197 = vector.shape_cast %185 : vector<8x128xf32> to vector<1x8x128xf32>
    tpu.vector_store %arg5[%194, %c0_93, %c0_94], %197 {strides = array<i32>} : memref<8x8x128xf32, #tpu.memory_space<vmem>>, vector<1x8x128xf32>,
    %c5_i32 = arith.constant 5 : i32
    %c0_95 = arith.constant 0 : index
    %c0_96 = arith.constant 0 : index
    %198 = vector.load %arg6[%c0_95, %c0_96] : memref<8x128xf32, #tpu.memory_space<vmem>>, vector<8x128xf32>
    %c0_97 = arith.constant 0 : index
    %c0_98 = arith.constant 0 : index
    %199 = vector.load %arg7[%c0_97, %c0_98] : memref<8x128xf32, #tpu.memory_space<vmem>>, vector<8x128xf32>
    %200 = arith.index_cast %c5_i32 : i32 to index
    %c0_99 = arith.constant 0 : index
    %c0_100 = arith.constant 0 : index
    %201 = vector.load %arg2[%200, %c0_99, %c0_100] : memref<8x8x512xf32, #tpu.memory_space<vmem>>, vector<1x8x512xf32>
    %202 = vector.shape_cast %201 : vector<1x8x512xf32> to vector<8x512xf32>
    %c0_101 = arith.constant 0 : index
    %c0_102 = arith.constant 0 : index
    %203 = vector.load %arg3[%c0_101, %c0_102] : memref<128x512xf32, #tpu.memory_space<vmem>>, vector<128x512xf32>
    %cst_103 = arith.constant dense<0.000000e+00> : vector<8x512xf32>
    %204 = tpu.matmul %198, %203, %cst_103 {dimension_numbers = #tpu.dot_dimension_numbers<[1], [0], [0], [1], [0, 0, 1, 1], [], []>} : vector<8x128xf32>, vector<128x512xf32>, vector<8x512xf32> -> vector<8x512xf32>
    %205 = arith.addf %202, %204 : vector<8x512xf32>
    %206 = vector.extract_strided_slice %205 {offsets = [0, 0], sizes = [8, 256], strides = [1, 1]} : vector<8x512xf32> to vector<8x256xf32>
    %207 = arith.negf %206 : vector<8x256xf32>
    %208 = math.exp %207 : vector<8x256xf32>
    %cst_104 = arith.constant 1.000000e+00 : f32
    %209 = vector.broadcast %cst_104 : f32 to vector<8x256xf32>
    %210 = arith.addf %209, %208 : vector<8x256xf32>
    %211 = arith.divf %209, %210 : vector<8x256xf32>
    %212 = vector.extract_strided_slice %211 {offsets = [0, 0], sizes = [8, 128], strides = [1, 1]} : vector<8x256xf32> to vector<8x128xf32>
    %213 = vector.extract_strided_slice %211 {offsets = [0, 128], sizes = [8, 128], strides = [1, 1]} : vector<8x256xf32> to vector<8x128xf32>
    %214 = vector.extract_strided_slice %205 {offsets = [0, 256], sizes = [8, 128], strides = [1, 1]} : vector<8x512xf32> to vector<8x128xf32>
    %215 = math.tanh %214 : vector<8x128xf32>
    %216 = vector.extract_strided_slice %205 {offsets = [0, 384], sizes = [8, 128], strides = [1, 1]} : vector<8x512xf32> to vector<8x128xf32>
    %217 = arith.negf %216 : vector<8x128xf32>
    %218 = math.exp %217 : vector<8x128xf32>
    %cst_105 = arith.constant 1.000000e+00 : f32
    %219 = vector.broadcast %cst_105 : f32 to vector<8x128xf32>
    %220 = arith.addf %219, %218 : vector<8x128xf32>
    %221 = arith.divf %219, %220 : vector<8x128xf32>
    %222 = arith.mulf %213, %199 : vector<8x128xf32>
    %223 = arith.mulf %212, %215 : vector<8x128xf32>
    %224 = arith.addf %222, %223 : vector<8x128xf32>
    %225 = math.tanh %199 : vector<8x128xf32>
    %226 = arith.mulf %221, %225 : vector<8x128xf32>
    %c0_106 = arith.constant 0 : index
    %c0_107 = arith.constant 0 : index
    %227 = vector.load %arg6[%c0_106, %c0_107] : memref<8x128xf32, #tpu.memory_space<vmem>>, vector<8x128xf32>
    tpu.vector_store %arg6[%c0_106, %c0_107], %226 {strides = array<i32>} : memref<8x128xf32, #tpu.memory_space<vmem>>, vector<8x128xf32>,
    %c0_108 = arith.constant 0 : index
    %c0_109 = arith.constant 0 : index
    %228 = vector.load %arg7[%c0_108, %c0_109] : memref<8x128xf32, #tpu.memory_space<vmem>>, vector<8x128xf32>
    tpu.vector_store %arg7[%c0_108, %c0_109], %224 {strides = array<i32>} : memref<8x128xf32, #tpu.memory_space<vmem>>, vector<8x128xf32>,
    %229 = arith.index_cast %c5_i32 : i32 to index
    %c0_110 = arith.constant 0 : index
    %c0_111 = arith.constant 0 : index
    %230 = vector.load %arg4[%229, %c0_110, %c0_111] : memref<8x8x128xf32, #tpu.memory_space<vmem>>, vector<1x8x128xf32>
    %231 = vector.shape_cast %230 : vector<1x8x128xf32> to vector<8x128xf32>
    %232 = vector.shape_cast %226 : vector<8x128xf32> to vector<1x8x128xf32>
    tpu.vector_store %arg4[%229, %c0_110, %c0_111], %232 {strides = array<i32>} : memref<8x8x128xf32, #tpu.memory_space<vmem>>, vector<1x8x128xf32>,
    %233 = arith.index_cast %c5_i32 : i32 to index
    %c0_112 = arith.constant 0 : index
    %c0_113 = arith.constant 0 : index
    %234 = vector.load %arg5[%233, %c0_112, %c0_113] : memref<8x8x128xf32, #tpu.memory_space<vmem>>, vector<1x8x128xf32>
    %235 = vector.shape_cast %234 : vector<1x8x128xf32> to vector<8x128xf32>
    %236 = vector.shape_cast %224 : vector<8x128xf32> to vector<1x8x128xf32>
    tpu.vector_store %arg5[%233, %c0_112, %c0_113], %236 {strides = array<i32>} : memref<8x8x128xf32, #tpu.memory_space<vmem>>, vector<1x8x128xf32>,
    %c6_i32 = arith.constant 6 : i32
    %c0_114 = arith.constant 0 : index
    %c0_115 = arith.constant 0 : index
    %237 = vector.load %arg6[%c0_114, %c0_115] : memref<8x128xf32, #tpu.memory_space<vmem>>, vector<8x128xf32>
    %c0_116 = arith.constant 0 : index
    %c0_117 = arith.constant 0 : index
    %238 = vector.load %arg7[%c0_116, %c0_117] : memref<8x128xf32, #tpu.memory_space<vmem>>, vector<8x128xf32>
    %239 = arith.index_cast %c6_i32 : i32 to index
    %c0_118 = arith.constant 0 : index
    %c0_119 = arith.constant 0 : index
    %240 = vector.load %arg2[%239, %c0_118, %c0_119] : memref<8x8x512xf32, #tpu.memory_space<vmem>>, vector<1x8x512xf32>
    %241 = vector.shape_cast %240 : vector<1x8x512xf32> to vector<8x512xf32>
    %c0_120 = arith.constant 0 : index
    %c0_121 = arith.constant 0 : index
    %242 = vector.load %arg3[%c0_120, %c0_121] : memref<128x512xf32, #tpu.memory_space<vmem>>, vector<128x512xf32>
    %cst_122 = arith.constant dense<0.000000e+00> : vector<8x512xf32>
    %243 = tpu.matmul %237, %242, %cst_122 {dimension_numbers = #tpu.dot_dimension_numbers<[1], [0], [0], [1], [0, 0, 1, 1], [], []>} : vector<8x128xf32>, vector<128x512xf32>, vector<8x512xf32> -> vector<8x512xf32>
    %244 = arith.addf %241, %243 : vector<8x512xf32>
    %245 = vector.extract_strided_slice %244 {offsets = [0, 0], sizes = [8, 256], strides = [1, 1]} : vector<8x512xf32> to vector<8x256xf32>
    %246 = arith.negf %245 : vector<8x256xf32>
    %247 = math.exp %246 : vector<8x256xf32>
    %cst_123 = arith.constant 1.000000e+00 : f32
    %248 = vector.broadcast %cst_123 : f32 to vector<8x256xf32>
    %249 = arith.addf %248, %247 : vector<8x256xf32>
    %250 = arith.divf %248, %249 : vector<8x256xf32>
    %251 = vector.extract_strided_slice %250 {offsets = [0, 0], sizes = [8, 128], strides = [1, 1]} : vector<8x256xf32> to vector<8x128xf32>
    %252 = vector.extract_strided_slice %250 {offsets = [0, 128], sizes = [8, 128], strides = [1, 1]} : vector<8x256xf32> to vector<8x128xf32>
    %253 = vector.extract_strided_slice %244 {offsets = [0, 256], sizes = [8, 128], strides = [1, 1]} : vector<8x512xf32> to vector<8x128xf32>
    %254 = math.tanh %253 : vector<8x128xf32>
    %255 = vector.extract_strided_slice %244 {offsets = [0, 384], sizes = [8, 128], strides = [1, 1]} : vector<8x512xf32> to vector<8x128xf32>
    %256 = arith.negf %255 : vector<8x128xf32>
    %257 = math.exp %256 : vector<8x128xf32>
    %cst_124 = arith.constant 1.000000e+00 : f32
    %258 = vector.broadcast %cst_124 : f32 to vector<8x128xf32>
    %259 = arith.addf %258, %257 : vector<8x128xf32>
    %260 = arith.divf %258, %259 : vector<8x128xf32>
    %261 = arith.mulf %252, %238 : vector<8x128xf32>
    %262 = arith.mulf %251, %254 : vector<8x128xf32>
    %263 = arith.addf %261, %262 : vector<8x128xf32>
    %264 = math.tanh %238 : vector<8x128xf32>
    %265 = arith.mulf %260, %264 : vector<8x128xf32>
    %c0_125 = arith.constant 0 : index
    %c0_126 = arith.constant 0 : index
    %266 = vector.load %arg6[%c0_125, %c0_126] : memref<8x128xf32, #tpu.memory_space<vmem>>, vector<8x128xf32>
    tpu.vector_store %arg6[%c0_125, %c0_126], %265 {strides = array<i32>} : memref<8x128xf32, #tpu.memory_space<vmem>>, vector<8x128xf32>,
    %c0_127 = arith.constant 0 : index
    %c0_128 = arith.constant 0 : index
    %267 = vector.load %arg7[%c0_127, %c0_128] : memref<8x128xf32, #tpu.memory_space<vmem>>, vector<8x128xf32>
    tpu.vector_store %arg7[%c0_127, %c0_128], %263 {strides = array<i32>} : memref<8x128xf32, #tpu.memory_space<vmem>>, vector<8x128xf32>,
    %268 = arith.index_cast %c6_i32 : i32 to index
    %c0_129 = arith.constant 0 : index
    %c0_130 = arith.constant 0 : index
    %269 = vector.load %arg4[%268, %c0_129, %c0_130] : memref<8x8x128xf32, #tpu.memory_space<vmem>>, vector<1x8x128xf32>
    %270 = vector.shape_cast %269 : vector<1x8x128xf32> to vector<8x128xf32>
    %271 = vector.shape_cast %265 : vector<8x128xf32> to vector<1x8x128xf32>
    tpu.vector_store %arg4[%268, %c0_129, %c0_130], %271 {strides = array<i32>} : memref<8x8x128xf32, #tpu.memory_space<vmem>>, vector<1x8x128xf32>,
    %272 = arith.index_cast %c6_i32 : i32 to index
    %c0_131 = arith.constant 0 : index
    %c0_132 = arith.constant 0 : index
    %273 = vector.load %arg5[%272, %c0_131, %c0_132] : memref<8x8x128xf32, #tpu.memory_space<vmem>>, vector<1x8x128xf32>
    %274 = vector.shape_cast %273 : vector<1x8x128xf32> to vector<8x128xf32>
    %275 = vector.shape_cast %263 : vector<8x128xf32> to vector<1x8x128xf32>
    tpu.vector_store %arg5[%272, %c0_131, %c0_132], %275 {strides = array<i32>} : memref<8x8x128xf32, #tpu.memory_space<vmem>>, vector<1x8x128xf32>,
    %c7_i32 = arith.constant 7 : i32
    %c0_133 = arith.constant 0 : index
    %c0_134 = arith.constant 0 : index
    %276 = vector.load %arg6[%c0_133, %c0_134] : memref<8x128xf32, #tpu.memory_space<vmem>>, vector<8x128xf32>
    %c0_135 = arith.constant 0 : index
    %c0_136 = arith.constant 0 : index
    %277 = vector.load %arg7[%c0_135, %c0_136] : memref<8x128xf32, #tpu.memory_space<vmem>>, vector<8x128xf32>
    %278 = arith.index_cast %c7_i32 : i32 to index
    %c0_137 = arith.constant 0 : index
    %c0_138 = arith.constant 0 : index
    %279 = vector.load %arg2[%278, %c0_137, %c0_138] : memref<8x8x512xf32, #tpu.memory_space<vmem>>, vector<1x8x512xf32>
    %280 = vector.shape_cast %279 : vector<1x8x512xf32> to vector<8x512xf32>
    %c0_139 = arith.constant 0 : index
    %c0_140 = arith.constant 0 : index
    %281 = vector.load %arg3[%c0_139, %c0_140] : memref<128x512xf32, #tpu.memory_space<vmem>>, vector<128x512xf32>
    %cst_141 = arith.constant dense<0.000000e+00> : vector<8x512xf32>
    %282 = tpu.matmul %276, %281, %cst_141 {dimension_numbers = #tpu.dot_dimension_numbers<[1], [0], [0], [1], [0, 0, 1, 1], [], []>} : vector<8x128xf32>, vector<128x512xf32>, vector<8x512xf32> -> vector<8x512xf32>
    %283 = arith.addf %280, %282 : vector<8x512xf32>
    %284 = vector.extract_strided_slice %283 {offsets = [0, 0], sizes = [8, 256], strides = [1, 1]} : vector<8x512xf32> to vector<8x256xf32>
    %285 = arith.negf %284 : vector<8x256xf32>
    %286 = math.exp %285 : vector<8x256xf32>
    %cst_142 = arith.constant 1.000000e+00 : f32
    %287 = vector.broadcast %cst_142 : f32 to vector<8x256xf32>
    %288 = arith.addf %287, %286 : vector<8x256xf32>
    %289 = arith.divf %287, %288 : vector<8x256xf32>
    %290 = vector.extract_strided_slice %289 {offsets = [0, 0], sizes = [8, 128], strides = [1, 1]} : vector<8x256xf32> to vector<8x128xf32>
    %291 = vector.extract_strided_slice %289 {offsets = [0, 128], sizes = [8, 128], strides = [1, 1]} : vector<8x256xf32> to vector<8x128xf32>
    %292 = vector.extract_strided_slice %283 {offsets = [0, 256], sizes = [8, 128], strides = [1, 1]} : vector<8x512xf32> to vector<8x128xf32>
    %293 = math.tanh %292 : vector<8x128xf32>
    %294 = vector.extract_strided_slice %283 {offsets = [0, 384], sizes = [8, 128], strides = [1, 1]} : vector<8x512xf32> to vector<8x128xf32>
    %295 = arith.negf %294 : vector<8x128xf32>
    %296 = math.exp %295 : vector<8x128xf32>
    %cst_143 = arith.constant 1.000000e+00 : f32
    %297 = vector.broadcast %cst_143 : f32 to vector<8x128xf32>
    %298 = arith.addf %297, %296 : vector<8x128xf32>
    %299 = arith.divf %297, %298 : vector<8x128xf32>
    %300 = arith.mulf %291, %277 : vector<8x128xf32>
    %301 = arith.mulf %290, %293 : vector<8x128xf32>
    %302 = arith.addf %300, %301 : vector<8x128xf32>
    %303 = math.tanh %277 : vector<8x128xf32>
    %304 = arith.mulf %299, %303 : vector<8x128xf32>
    %c0_144 = arith.constant 0 : index
    %c0_145 = arith.constant 0 : index
    %305 = vector.load %arg6[%c0_144, %c0_145] : memref<8x128xf32, #tpu.memory_space<vmem>>, vector<8x128xf32>
    tpu.vector_store %arg6[%c0_144, %c0_145], %304 {strides = array<i32>} : memref<8x128xf32, #tpu.memory_space<vmem>>, vector<8x128xf32>,
    %c0_146 = arith.constant 0 : index
    %c0_147 = arith.constant 0 : index
    %306 = vector.load %arg7[%c0_146, %c0_147] : memref<8x128xf32, #tpu.memory_space<vmem>>, vector<8x128xf32>
    tpu.vector_store %arg7[%c0_146, %c0_147], %302 {strides = array<i32>} : memref<8x128xf32, #tpu.memory_space<vmem>>, vector<8x128xf32>,
    %307 = arith.index_cast %c7_i32 : i32 to index
    %c0_148 = arith.constant 0 : index
    %c0_149 = arith.constant 0 : index
    %308 = vector.load %arg4[%307, %c0_148, %c0_149] : memref<8x8x128xf32, #tpu.memory_space<vmem>>, vector<1x8x128xf32>
    %309 = vector.shape_cast %308 : vector<1x8x128xf32> to vector<8x128xf32>
    %310 = vector.shape_cast %304 : vector<8x128xf32> to vector<1x8x128xf32>
    tpu.vector_store %arg4[%307, %c0_148, %c0_149], %310 {strides = array<i32>} : memref<8x8x128xf32, #tpu.memory_space<vmem>>, vector<1x8x128xf32>,
    %311 = arith.index_cast %c7_i32 : i32 to index
    %c0_150 = arith.constant 0 : index
    %c0_151 = arith.constant 0 : index
    %312 = vector.load %arg5[%311, %c0_150, %c0_151] : memref<8x8x128xf32, #tpu.memory_space<vmem>>, vector<1x8x128xf32>
    %313 = vector.shape_cast %312 : vector<1x8x128xf32> to vector<8x128xf32>
    %314 = vector.shape_cast %302 : vector<8x128xf32> to vector<1x8x128xf32>
    tpu.vector_store %arg5[%311, %c0_150, %c0_151], %314 {strides = array<i32>} : memref<8x8x128xf32, #tpu.memory_space<vmem>>, vector<1x8x128xf32>,
    %c8_i32 = arith.constant 8 : i32
    return
  }
  func.func @transform_0(%arg0: i32, %arg1: i32) -> (i32, i32, i32) {
    %c0_i32 = arith.constant 0 : i32
    %c0_i32_0 = arith.constant 0 : i32
    return %arg1, %arg0, %c0_i32 : i32, i32, i32
  }
  func.func @transform_1(%arg0: i32, %arg1: i32) -> (i32, i32) {
    %c0_i32 = arith.constant 0 : i32
    %c0_i32_0 = arith.constant 0 : i32
    %c0_i32_1 = arith.constant 0 : i32
    return %c0_i32, %c0_i32_0 : i32, i32
  }
  func.func @transform_2(%arg0: i32, %arg1: i32) -> (i32, i32, i32) {
    %c0_i32 = arith.constant 0 : i32
    %c0_i32_0 = arith.constant 0 : i32
    return %arg1, %arg0, %c0_i32 : i32, i32, i32
  }
  func.func @transform_3(%arg0: i32, %arg1: i32) -> (i32, i32, i32) {
    %c0_i32 = arith.constant 0 : i32
    %c0_i32_0 = arith.constant 0 : i32
    return %arg1, %arg0, %c0_i32 : i32, i32, i32
  }
}

</mosaic_0001>

<bundles_post_ra>
// kernel: tpu_custom_call.1
= control target key start
LH: loop header
LB: loop body
LE: loop exit
PB: predicated region body
PF: predicated region fallthrough
CT: control target
= control target key end

     0   :  { %9 = vsyncpa [#allocation5], 0  ;;  %s3158_s0 = inlined_call_operand.hbm [shape: f32[8,8,512], index: 0, kind: input, shape index: {}]   ;;  %s3159_s1 = inlined_call_operand.hbm [shape: f32[128,512], index: 1, kind: input, shape index: {}]   ;;  %s3160_s2 = inlined_call_operand.hbm [shape: f32[8,8,128], index: 2, kind: output, shape index: {0}]   ;;  %s3161_s3 = inlined_call_operand.hbm [shape: f32[8,8,128], index: 3, kind: output, shape index: {1}]  }
   0x1   :  { %10 = vsyncpa [#allocation8], 0 }
   0x2   :  { %11 = vsyncpa [#allocation6], 0 }
   0x3   :  { %12 = vsyncpa [#allocation11], 0  ;;  %s17_s14 = sshll.u32 %s3158_s0, 4  ;;  %s2145_s15 = smov [#allocation4]   ;;  %s18_s14 = int_to_ptr.hbm [resolvable:$true] %s17_s14 }
   0x4   :  { %s19_s16 = sshll.u32 %s2145_s15, 4  ;;  %s30_s19 = sshll.u32 %s3159_s1, 4  ;;  %s20_s16 = int_to_ptr.vmem [resolvable:$true] %s19_s16  ;;  %s31_s19 = int_to_ptr.hbm [resolvable:$true] %s30_s19 }
   0x5   :  { %s2146_s20 = smov 512   ;;  %s2147_s21 = smov 32  }
   0x6   :  { %25 = dma.hbm_to_vmem [thread:$0]  %s18_s14, 4096, %s20_s16, [#allocation5], %s2146_s20, %s2146_s20, %s2147_s21  }
   0x7   :  { %s2148_s22 = smov [#allocation7]  }
   0x8   :  { %s32_s23 = sshll.u32 %s2148_s22, 4  ;;  %s33_s23 = int_to_ptr.vmem [resolvable:$true] %s32_s23 }
   0x9   :  { %38 = dma.hbm_to_vmem [thread:$0]  %s31_s19, 8192, %s33_s23, [#allocation8], %s2146_s20, %s2146_s20, %s2147_s21  }
   0xa   :  { %2137 = dma.done.wait [#allocation5], 4096  }
   0xb   :  { %2138 = vsyncadd [#allocation5], 4294963200 }
   0xc   :  { %2139 = dma.done.wait [#allocation8], 8192  }
   0xd   :  { %2140 = vsyncadd [#allocation8], 4294959104  ;;  %v2180_v0 = vld [vmem:[#allocation7 + $0x1f8] sm:$0xff]  ;;  %v2193_v5 = vld [vmem:[#allocation7 + $0x1e0] sm:$0xff]  ;;  %v2149_v59 = vmov 0.0   ;;  %s2150_s0 = smov [#allocation10]  }
   0xe   :  { %v2182_v1 = vld [vmem:[#allocation7 + $0x1d8] sm:$0xff]  ;;  %183 = vmatpush.msra.mxu3 %v2180_v0  ;;  %v2195_v6 = vld [vmem:[#allocation7 + $0x1e8] sm:$0xff]  ;;  %123 = vmatpush.msra.mxu0 %v2193_v5  ;;  %v2199_v7 = vld [vmem:[#allocation7 + $0x1f0] sm:$0xff]  ;;  %s1859_s1 = sshll.u32 %s2150_s0, 4  ;;  %s1861_s26 = sshll.u32 %s3161_s3, 4  ;;  %s1860_s1 = int_to_ptr.vmem [resolvable:$true] %s1859_s1  ;;  %s1862_s26 = int_to_ptr.hbm [resolvable:$true] %s1861_s26 }
   0xf   :  { %v2185_v2 = vld [vmem:[#allocation7 + $0x1b8] sm:$0xff]  ;;  %143 = vmatpush.msra.mxu1 %v2195_v6  ;;  %v2201_v8 = vld [vmem:[#allocation7 + $0x1c0] sm:$0xff]  ;;  %v2203_v9 = vld [vmem:[#allocation7 + $0x1c8] sm:$0xff]  ;;  %163 = vmatpush.msra.mxu2 %v2199_v7  ;;  %s2151_s27 = smov [#allocation9]   ;;  %s1848_s4 = sshll.u32 %s3160_s2, 4  ;;  %s1849_s4 = int_to_ptr.hbm [resolvable:$true] %s1848_s4 }
  0x10   :  { %184 = vmatpush.msra.mxu3 %v2182_v1  ;;  %v2188_v3 = vld [vmem:[#allocation7 + $0x198] sm:$0xff]  ;;  %v2207_v10 = vld [vmem:[#allocation7 + $0x1d0] sm:$0xff]  ;;  %v2209_v11 = vld [vmem:[#allocation7 + $0x1a0] sm:$0xff]  ;;  %124 = vmatpush.msra.mxu0 %v2201_v8  ;;  %s1846_s28 = sshll.u32 %s2151_s27, 4  ;;  %s2152_s3 = smov 128   ;;  %s1847_s28 = int_to_ptr.vmem [resolvable:$true] %s1846_s28 }
  0x11   :  { %v2191_v4 = vld [vmem:[#allocation7 + $0x178] sm:$0xff]  ;;  %v2211_v12 = vld [vmem:[#allocation7 + $0x1a8] sm:$0xff]  ;;  %144 = vmatpush.msra.mxu1 %v2203_v9  ;;  %v2217_v14 = vld [vmem:[#allocation7 + $0x1b0] sm:$0xff]  ;;  %164 = vmatpush.msra.mxu2 %v2207_v10  ;;  %s2153_s5 = smov 8  }
  0x12   :  { %185 = vmatpush.msra.mxu3 %v2185_v2  ;;  %v2213_v13 = vld [vmem:[#allocation7 + $0x158] sm:$0xff]  ;;  %v2221_v15 = vld [vmem:[#allocation7 + $0x180] sm:$0xff]  ;;  %v2223_v16 = vld [vmem:[#allocation7 + $0x188] sm:$0xff]  ;;  %125 = vmatpush.msra.mxu0 %v2209_v11 }
  0x13   :  { %v2225_v17 = vld [vmem:[#allocation7 + $0x138] sm:$0xff]  ;;  %145 = vmatpush.msra.mxu1 %v2211_v12  ;;  %v2229_v18 = vld [vmem:[#allocation7 + $0x190] sm:$0xff]  ;;  %165 = vmatpush.msra.mxu2 %v2217_v14  ;;  %v2233_v19 = vld [vmem:[#allocation7 + $0x160] sm:$0xff] }
  0x14   :  { %186 = vmatpush.msra.mxu3 %v2188_v3  ;;  %v2235_v20 = vld [vmem:[#allocation7 + $0x168] sm:$0xff]  ;;  %v2237_v21 = vld [vmem:[#allocation7 + $0x118] sm:$0xff]  ;;  %126 = vmatpush.msra.mxu0 %v2221_v15  ;;  %v2241_v22 = vld [vmem:[#allocation7 + $0x170] sm:$0xff] }
  0x15   :  { %146 = vmatpush.msra.mxu1 %v2223_v16  ;;  %166 = vmatpush.msra.mxu2 %v2229_v18  ;;  %v2245_v23 = vld [vmem:[#allocation7 + $0x140] sm:$0xff]  ;;  %v2247_v24 = vld [vmem:[#allocation7 + $0x148] sm:$0xff]  ;;  %v2249_v25 = vld [vmem:[#allocation7 + $0xf8] sm:$0xff] }
  0x16   :  { %187 = vmatpush.msra.mxu3 %v2191_v4  ;;  %127 = vmatpush.msra.mxu0 %v2233_v19  ;;  %v2253_v26 = vld [vmem:[#allocation7 + $0x150] sm:$0xff]  ;;  %v2257_v27 = vld [vmem:[#allocation7 + $0x120] sm:$0xff]  ;;  %v2259_v28 = vld [vmem:[#allocation7 + $0x128] sm:$0xff] }
  0x17   :  { %147 = vmatpush.msra.mxu1 %v2235_v20  ;;  %167 = vmatpush.msra.mxu2 %v2241_v22  ;;  %v2261_v29 = vld [vmem:[#allocation7 + $0xd8] sm:$0xff]  ;;  %v2265_v30 = vld [vmem:[#allocation7 + $0x130] sm:$0xff]  ;;  %v2269_v31 = vld [vmem:[#allocation7 + $0x100] sm:$0xff] }
  0x18   :  { %188 = vmatpush.msra.mxu3 %v2213_v13  ;;  %128 = vmatpush.msra.mxu0 %v2245_v23  ;;  %v2271_v32 = vld [vmem:[#allocation7 + $0x108] sm:$0xff]  ;;  %v2273_v33 = vld [vmem:[#allocation7 + $0xb8] sm:$0xff]  ;;  %v2277_v34 = vld [vmem:[#allocation7 + $0x110] sm:$0xff] }
  0x19   :  { %148 = vmatpush.msra.mxu1 %v2247_v24  ;;  %168 = vmatpush.msra.mxu2 %v2253_v26  ;;  %v2281_v35 = vld [vmem:[#allocation7 + $0xe0] sm:$0xff]  ;;  %v2283_v36 = vld [vmem:[#allocation7 + $0xe8] sm:$0xff]  ;;  %v2285_v37 = vld [vmem:[#allocation7 + $0x98] sm:$0xff] }
  0x1a   :  { %189 = vmatpush.msra.mxu3 %v2225_v17  ;;  %129 = vmatpush.msra.mxu0 %v2257_v27  ;;  %v2289_v38 = vld [vmem:[#allocation7 + $0xf0] sm:$0xff]  ;;  %v2293_v39 = vld [vmem:[#allocation7 + $0xc0] sm:$0xff]  ;;  %v2295_v40 = vld [vmem:[#allocation7 + $0xc8] sm:$0xff] }
  0x1b   :  { %149 = vmatpush.msra.mxu1 %v2259_v28  ;;  %169 = vmatpush.msra.mxu2 %v2265_v30  ;;  %v2297_v41 = vld [vmem:[#allocation7 + $0x78] sm:$0xff]  ;;  %v2301_v42 = vld [vmem:[#allocation7 + $0xd0] sm:$0xff]  ;;  %v2305_v43 = vld [vmem:[#allocation7 + $0xa0] sm:$0xff] }
  0x1c   :  { %190 = vmatpush.msra.mxu3 %v2237_v21  ;;  %130 = vmatpush.msra.mxu0 %v2269_v31  ;;  %v2307_v44 = vld [vmem:[#allocation7 + $0xa8] sm:$0xff]  ;;  %v2309_v45 = vld [vmem:[#allocation7 + $0x58] sm:$0xff]  ;;  %v2313_v46 = vld [vmem:[#allocation7 + $0xb0] sm:$0xff] }
  0x1d   :  { %150 = vmatpush.msra.mxu1 %v2271_v32  ;;  %170 = vmatpush.msra.mxu2 %v2277_v34  ;;  %v2317_v47 = vld [vmem:[#allocation7 + $0x80] sm:$0xff]  ;;  %v2319_v48 = vld [vmem:[#allocation7 + $0x88] sm:$0xff]  ;;  %v66_v49 = vld [vmem:[#allocation7 + $0x38] sm:$0xff] }
  0x1e   :  { %191 = vmatpush.msra.mxu3 %v2249_v25  ;;  %131 = vmatpush.msra.mxu0 %v2281_v35  ;;  %v2323_v50 = vld [vmem:[#allocation7 + $0x90] sm:$0xff]  ;;  %v2327_v51 = vld [vmem:[#allocation7 + $0x60] sm:$0xff]  ;;  %v2329_v52 = vld [vmem:[#allocation7 + $0x68] sm:$0xff] }
  0x1f   :  { %151 = vmatpush.msra.mxu1 %v2283_v36  ;;  %171 = vmatpush.msra.mxu2 %v2289_v38  ;;  %v62_v53 = vld [vmem:[#allocation7 + $0x18] sm:$0xff]  ;;  %v2333_v54 = vld [vmem:[#allocation7 + $0x70] sm:$0xff]  ;;  %v2336_v55 = vld [vmem:[#allocation7 + $0x40] sm:$0xff] }
  0x20   :  { %192 = vmatpush.msra.mxu3 %v2261_v29  ;;  %132 = vmatpush.msra.mxu0 %v2293_v39  ;;  %v2340_v56 = vld [vmem:[#allocation7 + $0x48] sm:$0xff]  ;;  %v2342_v57 = vld [vmem:[#allocation7 + $0x50] sm:$0xff]  ;;  %v2345_v58 = vld [vmem:[#allocation7 + $0x20] sm:$0xff] }
  0x21   :  { %152 = vmatpush.msra.mxu1 %v2295_v40  ;;  %172 = vmatpush.msra.mxu2 %v2301_v42  ;;  %v2349_v60 = vld [vmem:[#allocation7 + $0x28] sm:$0xff]  ;;  %v2351_v61 = vld [vmem:[#allocation7 + $0x30] sm:$0xff]  ;;  %v2386_v62 = vld [vmem:[#allocation7] sm:$0xff] }
  0x22   :  { %193 = vmatpush.msra.mxu3 %v2273_v33  ;;  %133 = vmatpush.msra.mxu0 %v2305_v43  ;;  %v2388_v63 = vld [vmem:[#allocation7 + $0x8] sm:$0xff] }
  0x23   :  { %153 = vmatpush.msra.mxu1 %v2307_v44  ;;  %173 = vmatpush.msra.mxu2 %v2313_v46 }
  0x24   :  { %194 = vmatpush.msra.mxu3 %v2285_v37  ;;  %134 = vmatpush.msra.mxu0 %v2317_v47 }
  0x25   :  { %154 = vmatpush.msra.mxu1 %v2319_v48  ;;  %174 = vmatpush.msra.mxu2 %v2323_v50 }
  0x26   :  { %195 = vmatpush.msra.mxu3 %v2297_v41  ;;  %135 = vmatpush.msra.mxu0 %v2327_v51 }
  0x27   :  { %155 = vmatpush.msra.mxu1 %v2329_v52  ;;  %175 = vmatpush.msra.mxu2 %v2333_v54 }
  0x28   :  { %196 = vmatpush.msra.mxu3 %v2309_v45  ;;  %136 = vmatpush.msra.mxu0 %v2336_v55 }
  0x29   :  { %156 = vmatpush.msra.mxu1 %v2340_v56  ;;  %176 = vmatpush.msra.mxu2 %v2342_v57 }
  0x2a   :  { %197 = vmatpush.msra.mxu3 %v66_v49  ;;  %137 = vmatpush.msra.mxu0 %v2345_v58 }
  0x2b   :  { %157 = vmatpush.msra.mxu1 %v2349_v60  ;;  %177 = vmatpush.msra.mxu2 %v2351_v61 }
  0x2c   :  { %198 = vmatpush.msra.mxu3 %v62_v53  ;;  %138 = vmatpush.msra.mxu0 %v2386_v62 }
  0x2d   :  { %199 = vmatmul.f32.vlgmr.msra.gmra.mxu3 %v2149_v59  ;;  %158 = vmatpush.msra.mxu1 %v2388_v63 }
  0x2e   :  { %405 = vmatpush.msrb.mxu3 %v2180_v0  ;;  %345 = vmatpush.msrb.mxu0 %v2193_v5 }
  0x2f   :  { %365 = vmatpush.msrb.mxu1 %v2195_v6  ;;  %139 = vmatmul.f32.vlgmr.msra.gmra.mxu0 %v2149_v59 }
  0x30   :  { %406 = vmatpush.msrb.mxu3 %v2182_v1  ;;  %346 = vmatpush.msrb.mxu0 %v2201_v8 }
  0x31   :  { %159 = vmatmul.f32.vlgmr.msra.gmra.mxu1 %v2149_v59 }
  0x32   :  { %407 = vmatpush.msrb.mxu3 %v2185_v2  ;;  %366 = vmatpush.msrb.mxu1 %v2203_v9 }
  0x33   :  { %347 = vmatpush.msrb.mxu0 %v2209_v11 }
  0x34   :  { %408 = vmatpush.msrb.mxu3 %v2188_v3  ;;  %367 = vmatpush.msrb.mxu1 %v2211_v12 }
  0x35   :  { %348 = vmatpush.msrb.mxu0 %v2221_v15 }
  0x36   :  { %409 = vmatpush.msrb.mxu3 %v2191_v4  ;;  %368 = vmatpush.msrb.mxu1 %v2223_v16 }
  0x37   :  { %349 = vmatpush.msrb.mxu0 %v2233_v19 }
  0x38   :  { %410 = vmatpush.msrb.mxu3 %v2213_v13  ;;  %369 = vmatpush.msrb.mxu1 %v2235_v20 }
  0x39   :  { %350 = vmatpush.msrb.mxu0 %v2245_v23 }
  0x3a   :  { %411 = vmatpush.msrb.mxu3 %v2225_v17  ;;  %370 = vmatpush.msrb.mxu1 %v2247_v24 }
  0x3b   :  { %351 = vmatpush.msrb.mxu0 %v2257_v27 }
  0x3c   :  { %412 = vmatpush.msrb.mxu3 %v2237_v21  ;;  %371 = vmatpush.msrb.mxu1 %v2259_v28 }
  0x3d   :  { %352 = vmatpush.msrb.mxu0 %v2269_v31 }
  0x3e   :  { %413 = vmatpush.msrb.mxu3 %v2249_v25  ;;  %372 = vmatpush.msrb.mxu1 %v2271_v32 }
  0x3f   :  { %353 = vmatpush.msrb.mxu0 %v2281_v35 }
  0x40   :  { %414 = vmatpush.msrb.mxu3 %v2261_v29  ;;  %373 = vmatpush.msrb.mxu1 %v2283_v36 }
  0x41   :  { %354 = vmatpush.msrb.mxu0 %v2293_v39 }
  0x42   :  { %415 = vmatpush.msrb.mxu3 %v2273_v33  ;;  %374 = vmatpush.msrb.mxu1 %v2295_v40 }
  0x43   :  { %355 = vmatpush.msrb.mxu0 %v2305_v43 }
  0x44   :  { %416 = vmatpush.msrb.mxu3 %v2285_v37  ;;  %375 = vmatpush.msrb.mxu1 %v2307_v44 }
  0x45   :  { %356 = vmatpush.msrb.mxu0 %v2317_v47 }
  0x46   :  { %417 = vmatpush.msrb.mxu3 %v2297_v41  ;;  %376 = vmatpush.msrb.mxu1 %v2319_v48 }
  0x47   :  { %357 = vmatpush.msrb.mxu0 %v2327_v51 }
  0x48   :  { %418 = vmatpush.msrb.mxu3 %v2309_v45  ;;  %377 = vmatpush.msrb.mxu1 %v2329_v52 }
  0x49   :  { %358 = vmatpush.msrb.mxu0 %v2336_v55 }
  0x4a   :  { %419 = vmatpush.msrb.mxu3 %v66_v49  ;;  %378 = vmatpush.msrb.mxu1 %v2340_v56 }
  0x4b   :  { %359 = vmatpush.msrb.mxu0 %v2345_v58 }
  0x4c   :  { %420 = vmatpush.msrb.mxu3 %v62_v53  ;;  %379 = vmatpush.msrb.mxu1 %v2349_v60 }
  0x4d   :  { %360 = vmatpush.msrb.mxu0 %v2386_v62 }
  0x4e   :  { %629 = vmatpush.msra.mxu3 %v2180_v0  ;;  %v2390_v0 = vld [vmem:[#allocation7 + $0x10] sm:$0xff]  ;;  %380 = vmatpush.msrb.mxu1 %v2388_v63 }
  0x4f   :  { %178 = vmatpush.msra.mxu2 %v2390_v0  ;;  %569 = vmatpush.msra.mxu0 %v2193_v5 }
  0x50   :  { %630 = vmatpush.msra.mxu3 %v2182_v1  ;;  %179 = vmatmul.f32.vlgmr.msra.gmra.mxu2 %v2149_v59  ;;  %v58_v1 = vld [vmem:[#allocation4 + $0x18] sm:$0xff] }
  0x51   :  { %385 = vmatpush.msrb.mxu2 %v2199_v7  ;;  %589 = vmatpush.msra.mxu1 %v2195_v6 }
  0x52   :  { %631 = vmatpush.msra.mxu3 %v2185_v2  ;;  %570 = vmatpush.msra.mxu0 %v2201_v8 }
  0x53   :  { %386 = vmatpush.msrb.mxu2 %v2207_v10  ;;  %590 = vmatpush.msra.mxu1 %v2203_v9 }
  0x54   :  { %632 = vmatpush.msra.mxu3 %v2188_v3  ;;  %571 = vmatpush.msra.mxu0 %v2209_v11 }
  0x55   :  { %387 = vmatpush.msrb.mxu2 %v2217_v14  ;;  %591 = vmatpush.msra.mxu1 %v2211_v12 }
  0x56   :  { %633 = vmatpush.msra.mxu3 %v2191_v4  ;;  %572 = vmatpush.msra.mxu0 %v2221_v15 }
  0x57   :  { %388 = vmatpush.msrb.mxu2 %v2229_v18  ;;  %592 = vmatpush.msra.mxu1 %v2223_v16 }
  0x58   :  { %634 = vmatpush.msra.mxu3 %v2213_v13  ;;  %573 = vmatpush.msra.mxu0 %v2233_v19  ;;  %v56_v19 = vld [vmem:[#allocation4 + $0x8] sm:$0xff] }
  0x59   :  { %389 = vmatpush.msrb.mxu2 %v2241_v22  ;;  %593 = vmatpush.msra.mxu1 %v2235_v20 }
  0x5a   :  { %635 = vmatpush.msra.mxu3 %v2225_v17  ;;  %574 = vmatpush.msra.mxu0 %v2245_v23  ;;  %v55_v23 = vld [vmem:[#allocation4] sm:$0xff] }
  0x5b   :  { %390 = vmatpush.msrb.mxu2 %v2253_v26  ;;  %594 = vmatpush.msra.mxu1 %v2247_v24 }
  0x5c   :  { %636 = vmatpush.msra.mxu3 %v2237_v21  ;;  %575 = vmatpush.msra.mxu0 %v2257_v27 }
  0x5d   :  { %391 = vmatpush.msrb.mxu2 %v2265_v30  ;;  %595 = vmatpush.msra.mxu1 %v2259_v28 }
  0x5e   :  { %637 = vmatpush.msra.mxu3 %v2249_v25  ;;  %576 = vmatpush.msra.mxu0 %v2269_v31 }
  0x5f   :  { %392 = vmatpush.msrb.mxu2 %v2277_v34  ;;  %596 = vmatpush.msra.mxu1 %v2271_v32 }
  0x60   :  { %638 = vmatpush.msra.mxu3 %v2261_v29  ;;  %577 = vmatpush.msra.mxu0 %v2281_v35 }
  0x61   :  { %393 = vmatpush.msrb.mxu2 %v2289_v38  ;;  %597 = vmatpush.msra.mxu1 %v2283_v36 }
  0x62   :  { %639 = vmatpush.msra.mxu3 %v2273_v33  ;;  %578 = vmatpush.msra.mxu0 %v2293_v39  ;;  %v57_v33 = vld [vmem:[#allocation4 + $0x10] sm:$0xff] }
  0x63   :  { %394 = vmatpush.msrb.mxu2 %v2301_v42  ;;  %598 = vmatpush.msra.mxu1 %v2295_v40 }
  0x64   :  { %640 = vmatpush.msra.mxu3 %v2285_v37  ;;  %579 = vmatpush.msra.mxu0 %v2305_v43 }
  0x65   :  { %395 = vmatpush.msrb.mxu2 %v2313_v46  ;;  %599 = vmatpush.msra.mxu1 %v2307_v44 }
  0x66   :  { %641 = vmatpush.msra.mxu3 %v2297_v41  ;;  %580 = vmatpush.msra.mxu0 %v2317_v47 }
  0x67   :  { %396 = vmatpush.msrb.mxu2 %v2323_v50  ;;  %600 = vmatpush.msra.mxu1 %v2319_v48 }
  0x68   :  { %642 = vmatpush.msra.mxu3 %v2309_v45  ;;  %581 = vmatpush.msra.mxu0 %v2327_v51 }
  0x69   :  { %397 = vmatpush.msrb.mxu2 %v2333_v54  ;;  %601 = vmatpush.msra.mxu1 %v2329_v52 }
  0x6a   :  { %643 = vmatpush.msra.mxu3 %v66_v49  ;;  %582 = vmatpush.msra.mxu0 %v2336_v55 }
  0x6b   :  { %398 = vmatpush.msrb.mxu2 %v2342_v57  ;;  %602 = vmatpush.msra.mxu1 %v2340_v56 }
  0x6c   :  { %644 = vmatpush.msra.mxu3 %v62_v53  ;;  %583 = vmatpush.msra.mxu0 %v2345_v58  ;;  %v277_v58 = vld [vmem:[#allocation4 + $0x20] sm:$0xff] }
  0x6d   :  { %399 = vmatpush.msrb.mxu2 %v2351_v61  ;;  %603 = vmatpush.msra.mxu1 %v2349_v60 }
  0x6e   :  { %584 = vmatpush.msra.mxu0 %v2386_v62 }
  0x6f   :  { %400 = vmatpush.msrb.mxu2 %v2390_v0  ;;  %604 = vmatpush.msra.mxu1 %v2388_v63 }
  0x71   :  { %609 = vmatpush.msra.mxu2 %v2199_v7 }
  0x73   :  { %610 = vmatpush.msra.mxu2 %v2207_v10 }
  0x75   :  { %611 = vmatpush.msra.mxu2 %v2217_v14 }
  0x77   :  { %612 = vmatpush.msra.mxu2 %v2229_v18 }
  0x79   :  { %613 = vmatpush.msra.mxu2 %v2241_v22 }
  0x7b   :  { %614 = vmatpush.msra.mxu2 %v2253_v26 }
  0x7d   :  { %615 = vmatpush.msra.mxu2 %v2265_v30 }
  0x7f   :  { %616 = vmatpush.msra.mxu2 %v2277_v34 }
  0x81   :  { %617 = vmatpush.msra.mxu2 %v2289_v38 }
  0x83   :  { %618 = vmatpush.msra.mxu2 %v2301_v42 }
  0x85   :  { %619 = vmatpush.msra.mxu2 %v2313_v46 }
  0x87   :  { %620 = vmatpush.msra.mxu2 %v2323_v50 }
  0x89   :  { %621 = vmatpush.msra.mxu2 %v2333_v54 }
  0x8b   :  { %622 = vmatpush.msra.mxu2 %v2342_v57 }
  0x8d   :  { %623 = vmatpush.msra.mxu2 %v2351_v61 }
  0x8f   :  { %624 = vmatpush.msra.mxu2 %v2390_v0 }
  0xac   :  { %v140_v24 = vpop.f32.mrf.mxu0 }
  0xad   :  { %v203_v25 = vadd.f32 %v140_v24, %v55_v23 }
  0xae   :  { %v160_v20 = vpop.f32.mrf.mxu1 }
  0xaf   :  { %v204_v21 = vadd.f32 %v160_v20, %v56_v19  ;;  %v1880_v27 = vmul.f32 -1.442695, %v203_v25 }
  0xb0   :  { %v200_v2 = vpop.f32.mrf.mxu3 }
  0xb1   :  { %v206_v3 = vadd.f32 %v200_v2, %v58_v1  ;;  %v1881_v22 = vmul.f32 -1.442695, %v204_v21  ;;  %v280_v2 = vld [vmem:[#allocation4 + $0x38] sm:$0xff] }
  0xb3   :  { %v1882_v4 = vmul.f32 -1.442695, %v206_v3 }
  0xb5   :  { %1913 = vpow2.f32 %v1882_v4 }
  0xbb   :  { %v1914_v5 = vpop.eup %1913 }
  0xbc   :  { %v249_v6 = vadd.f32 1.0, %v1914_v5 }
  0xbe   :  { %1915 = vrcp.f32 %v249_v6  ;;  %v261_v10 = vand.u32 2147483648, %v249_v6  ;;  %v259_v12 = vand.u32 2147483647, %v249_v6  ;;  %vm255_vm1 = vweird.f32 %v249_v6 }
  0xbf   :  { %1917 = vtanh.f32 %v2149_v59  ;;  %v278_v59 = vld [vmem:[#allocation4 + $0x28] sm:$0xff] }
  0xc0   :  { %v262_v15 = vor.u32 1.1754944e-38, %v261_v10  ;;  %vm260_vm3 = vcmp.eq.f32.partialorder %v259_v12, 8.507059e+37  ;;  %1919 = vpow2.f32 %v1881_v22  ;;  %v279_v10 = vld [vmem:[#allocation4 + $0x30] sm:$0xff] }
  0xc1   :  { %1921 = vpow2.f32 %v1880_v27 }
  0xc4   :  { %v1916_v7 = vpop.eup %1915 }
  0xc5   :  { %v251_v8 = vmul.f32 %v1916_v7, %v249_v6  ;;  %vm256_vm0 = vweird.f32 %v1916_v7  ;;  %v1918_v14 = vpop.eup %1917 }
  0xc6   :  { %vm257_vm2 = vmor %vm255_vm1, %vm256_vm0  ;;  %v1920_v26 = vpop.eup %1919 }
  0xc7   :  { %v252_v9 = vsub.f32 1.0, %v251_v8  ;;  %v214_v28 = vadd.f32 1.0, %v1920_v26  ;;  %v1922_v29 = vpop.eup %1921 }
  0xc8   :  { %v213_v31 = vadd.f32 1.0, %v1922_v29 }
  0xc9   :  { %v253_v11 = vmul.f32 %v1916_v7, %v252_v9  ;;  %1923 = vrcp.f32 %v214_v28  ;;  %vm235_vm4 = vweird.f32 %v214_v28  ;;  %v241_v38 = vand.u32 2147483648, %v214_v28 }
  0xca   :  { %1925 = vrcp.f32 %v213_v31  ;;  %v239_v39 = vand.u32 2147483647, %v214_v28  ;;  %vm220_vm7 = vweird.f32 %v213_v31  ;;  %v226_v44 = vand.u32 2147483648, %v213_v31 }
  0xcb   :  { %v254_v13 = vadd.f32 %v1916_v7, %v253_v11  ;;  %v242_v43 = vor.u32 1.1754944e-38, %v241_v38  ;;  %v224_v46 = vand.u32 2147483647, %v213_v31 }
  0xcc   :  { %vm240_vm8 = vcmp.eq.f32.partialorder %v239_v39, 8.507059e+37  ;;  %v227_v49 = vor.u32 1.1754944e-38, %v226_v44 }
  0xcd   :  { %v258_v16 = vsel %vm257_vm2, %v1916_v7, %v254_v13  ;;  %vm225_vm11 = vcmp.eq.f32.partialorder %v224_v46, 8.507059e+37 }
  0xce   :  { %v263_v17 = vsel %vm260_vm3, %v262_v15, %v258_v16 }
  0xcf   :  { %v269_v18 = vmul.f32 %v1918_v14, %v263_v17  ;;  %v1924_v30 = vpop.eup %1923 }
  0xd0   :  { %v231_v32 = vmul.f32 %v1924_v30, %v214_v28  ;;  %vm236_vm5 = vweird.f32 %v1924_v30  ;;  %v1926_v41 = vpop.eup %1925 }
  0xd1   :  { %272 = vst [vmem:[#allocation9] sm:$0xff] %v269_v18  ;;  %361 = vmatmul.f32.vlgmr.msrb.gmra.mxu0 %v269_v18  ;;  %381 = vmatmul.f32.vlgmr.msrb.gmra.mxu1 %v269_v18  ;;  %vm237_vm6 = vmor %vm235_vm4, %vm236_vm5  ;;  %v216_v42 = vmul.f32 %v1926_v41, %v213_v31  ;;  %vm221_vm9 = vweird.f32 %v1926_v41 }
  0xd2   :  { %401 = vmatmul.f32.vlgmr.msrb.gmra.mxu2 %v269_v18  ;;  %421 = vmatmul.f32.vlgmr.msrb.gmra.mxu3 %v269_v18  ;;  %v232_v34 = vsub.f32 1.0, %v231_v32  ;;  %vm222_vm10 = vmor %vm220_vm7, %vm221_vm9 }
  0xd3   :  { %v180_v35 = vpop.f32.mrf.mxu2  ;;  %v217_v45 = vsub.f32 1.0, %v216_v42 }
  0xd4   :  { %v233_v36 = vmul.f32 %v1924_v30, %v232_v34  ;;  %v205_v37 = vadd.f32 %v180_v35, %v57_v33 }
  0xd5   :  { %v218_v48 = vmul.f32 %v1926_v41, %v217_v45 }
  0xd6   :  { %v234_v40 = vadd.f32 %v1924_v30, %v233_v36  ;;  %1927 = vtanh.f32 %v205_v37 }
  0xd7   :  { %v219_v52 = vadd.f32 %v1926_v41, %v218_v48 }
  0xd8   :  { %v238_v47 = vsel %vm237_vm6, %v1924_v30, %v234_v40 }
  0xd9   :  { %v243_v50 = vsel %vm240_vm8, %v242_v43, %v238_v47  ;;  %v223_v53 = vsel %vm222_vm10, %v1926_v41, %v219_v52  ;;  %v2505_v52 = vld [vmem:[#allocation7 + $0x1e8] sm:$0xff] }
  0xda   :  { %v265_v54 = vmul.f32 0.0, %v243_v50  ;;  %v228_v55 = vsel %vm225_vm11, %v227_v49, %v223_v53  ;;  %v2507_v53 = vld [vmem:[#allocation7 + $0x1f0] sm:$0xff]  ;;  %813 = vmatpush.msrb.mxu1 %v2505_v52 }
  0xdb   :  { %833 = vmatpush.msrb.mxu2 %v2507_v53 }
  0xdc   :  { %v1928_v51 = vpop.eup %1927 }
  0xdd   :  { %v266_v56 = vmul.f32 %v1928_v51, %v228_v55  ;;  %v2503_v51 = vld [vmem:[#allocation7 + $0x1e0] sm:$0xff] }
  0xde   :  { %793 = vmatpush.msrb.mxu0 %v2503_v51  ;;  %v2515_v55 = vld [vmem:[#allocation7 + $0x1c0] sm:$0xff] }
  0xdf   :  { %v2495_v57 = vadd.f32 %v266_v56, %v265_v54  ;;  %v2511_v54 = vld [vmem:[#allocation7 + $0x1f8] sm:$0xff]  ;;  %v2517_v56 = vld [vmem:[#allocation7 + $0x1c8] sm:$0xff] }
  0xe0   :  { %853 = vmatpush.msrb.mxu3 %v2511_v54  ;;  %794 = vmatpush.msrb.mxu0 %v2515_v55 }
  0xe1   :  { %273 = vst [vmem:[#allocation10] sm:$0xff] %v2495_v57  ;;  %814 = vmatpush.msrb.mxu1 %v2517_v56 }
 0x14e   :  { %v362_v60 = vpop.f32.mrf.mxu0  ;;  %v382_v61 = vpop.f32.mrf.mxu1 }
 0x14f   :  { %v425_v62 = vadd.f32 %v362_v60, %v277_v58  ;;  %v426_v63 = vadd.f32 %v382_v61, %v278_v59  ;;  %v2523_v58 = vld [vmem:[#allocation7 + $0x1d8] sm:$0xff]  ;;  %v2527_v59 = vld [vmem:[#allocation7 + $0x1a0] sm:$0xff]  ;;  %v2529_v60 = vld [vmem:[#allocation7 + $0x1a8] sm:$0xff] }
 0x150   :  { %854 = vmatpush.msrb.mxu3 %v2523_v58  ;;  %v2531_v61 = vld [vmem:[#allocation7 + $0x1b0] sm:$0xff]  ;;  %795 = vmatpush.msrb.mxu0 %v2527_v59 }
 0x151   :  { %v1883_v0 = vmul.f32 -1.442695, %v425_v62  ;;  %v1884_v1 = vmul.f32 -1.442695, %v426_v63  ;;  %815 = vmatpush.msrb.mxu1 %v2529_v60  ;;  %v2535_v62 = vld [vmem:[#allocation7 + $0x1b8] sm:$0xff]  ;;  %v2539_v63 = vld [vmem:[#allocation7 + $0x180] sm:$0xff] }
 0x152   :  { %3196 = vst [vmem:[#allocation16_spill] sm:$0xff] %v2535_v62  ;;  %855 = vmatpush.msrb.mxu3 %v2535_v62  ;;  %796 = vmatpush.msrb.mxu0 %v2539_v63 }
 0x153   :  { %1929 = vpow2.f32 %v1883_v0  ;;  %3197 = vst [vmem:[#allocation17_spill] sm:$0xff] %v2539_v63  ;;  %v2541_v0 = vld [vmem:[#allocation7 + $0x188] sm:$0xff] }
 0x154   :  { %1931 = vpow2.f32 %v1884_v1  ;;  %v2543_v1 = vld [vmem:[#allocation7 + $0x190] sm:$0xff]  ;;  %816 = vmatpush.msrb.mxu1 %v2541_v0 }
 0x155   :  { %v422_v3 = vpop.f32.mrf.mxu3  ;;  %v402_v11 = vpop.f32.mrf.mxu2  ;;  %3198 = vst [vmem:[#allocation18_spill] sm:$0xff] %v2543_v1 }
 0x156   :  { %v428_v4 = vadd.f32 %v422_v3, %v280_v2  ;;  %v427_v15 = vadd.f32 %v402_v11, %v279_v10  ;;  %v2547_v2 = vld [vmem:[#allocation7 + $0x198] sm:$0xff]  ;;  %v2551_v3 = vld [vmem:[#allocation7 + $0x160] sm:$0xff] }
 0x157   :  { %3199 = vst [vmem:[#allocation19_spill] sm:$0xff] %v2547_v2  ;;  %856 = vmatpush.msrb.mxu3 %v2547_v2  ;;  %797 = vmatpush.msrb.mxu0 %v2551_v3  ;;  %v2571_v10 = vld [vmem:[#allocation7 + $0x158] sm:$0xff]  ;;  %v2575_v11 = vld [vmem:[#allocation7 + $0x120] sm:$0xff] }
 0x158   :  { %v1885_v5 = vmul.f32 -1.442695, %v428_v4  ;;  %v2553_v4 = vld [vmem:[#allocation7 + $0x168] sm:$0xff]  ;;  %3202 = vst [vmem:[#allocation22_spill] sm:$0xff] %v2571_v10 }
 0x159   :  { %v1930_v6 = vpop.eup %1929  ;;  %817 = vmatpush.msrb.mxu1 %v2553_v4  ;;  %3203 = vst [vmem:[#allocation23_spill] sm:$0xff] %v2575_v11 }
 0x15a   :  { %v1932_v7 = vpop.eup %1931  ;;  %v435_v8 = vadd.f32 1.0, %v1930_v6  ;;  %1933 = vpow2.f32 %v1885_v5  ;;  %v2555_v5 = vld [vmem:[#allocation7 + $0x170] sm:$0xff]  ;;  %v2559_v6 = vld [vmem:[#allocation7 + $0x178] sm:$0xff] }
 0x15b   :  { %v436_v9 = vadd.f32 1.0, %v1932_v7  ;;  %857 = vmatpush.msrb.mxu3 %v2559_v6  ;;  %v2563_v7 = vld [vmem:[#allocation7 + $0x140] sm:$0xff] }
 0x15c   :  { %1935 = vrcp.f32 %v435_v8  ;;  %v448_v21 = vand.u32 2147483648, %v435_v8  ;;  %v446_v24 = vand.u32 2147483647, %v435_v8  ;;  %vm442_vm14 = vweird.f32 %v435_v8  ;;  %798 = vmatpush.msrb.mxu0 %v2563_v7 }
 0x15d   :  { %1937 = vrcp.f32 %v436_v9  ;;  %v463_v22 = vand.u32 2147483648, %v436_v9  ;;  %v461_v26 = vand.u32 2147483647, %v436_v9  ;;  %vm457_vm15 = vweird.f32 %v436_v9  ;;  %858 = vmatpush.msrb.mxu3 %v2571_v10 }
 0x15e   :  { %v449_v29 = vor.u32 1.1754944e-38, %v448_v21  ;;  %vm447_vm2 = vcmp.eq.f32.partialorder %v446_v24, 8.507059e+37  ;;  %799 = vmatpush.msrb.mxu0 %v2575_v11  ;;  %v2603_v21 = vld [vmem:[#allocation7 + $0xf0] sm:$0xff]  ;;  %v2613_v24 = vld [vmem:[#allocation7 + $0xc8] sm:$0xff] }
 0x15f   :  { %v464_v32 = vor.u32 1.1754944e-38, %v463_v22  ;;  %vm462_vm3 = vcmp.eq.f32.partialorder %v461_v26, 8.507059e+37  ;;  %3206 = vst [vmem:[#allocation26_spill] sm:$0xff] %v2603_v21  ;;  %v2607_v22 = vld [vmem:[#allocation7 + $0xf8] sm:$0xff] }
 0x160   :  { %v1934_v12 = vpop.eup %1933  ;;  %3207 = vst [vmem:[#allocation27_spill] sm:$0xff] %v2607_v22  ;;  %v2619_v26 = vld [vmem:[#allocation7 + $0xd8] sm:$0xff] }
 0x161   :  { %v471_v13 = vadd.f32 1.0, %v1934_v12  ;;  %v2577_v12 = vld [vmem:[#allocation7 + $0x128] sm:$0xff]  ;;  %3208 = vst [vmem:[#allocation28_spill] sm:$0xff] %v2613_v24 }
 0x162   :  { %v1936_v14 = vpop.eup %1935 }
 0x163   :  { %v1938_v16 = vpop.eup %1937  ;;  %v438_v17 = vmul.f32 %v1936_v14, %v435_v8  ;;  %1939 = vrcp.f32 %v471_v13  ;;  %vm443_vm12 = vweird.f32 %v1936_v14  ;;  %v483_v40 = vand.u32 2147483648, %v471_v13  ;;  %v2565_v8 = vld [vmem:[#allocation7 + $0x148] sm:$0xff] }
 0x164   :  { %v453_v18 = vmul.f32 %v1938_v16, %v436_v9  ;;  %1941 = vtanh.f32 %v427_v15  ;;  %vm458_vm13 = vweird.f32 %v1938_v16  ;;  %vm444_vm0 = vmor %vm442_vm14, %vm443_vm12  ;;  %v481_v43 = vand.u32 2147483647, %v471_v13  ;;  %3200 = vst [vmem:[#allocation20_spill] sm:$0xff] %v2565_v8  ;;  %v2567_v9 = vld [vmem:[#allocation7 + $0x150] sm:$0xff]  ;;  %818 = vmatpush.msrb.mxu1 %v2565_v8  ;;  %v2587_v15 = vld [vmem:[#allocation7 + $0x100] sm:$0xff] }
 0x165   :  { %v439_v19 = vsub.f32 1.0, %v438_v17  ;;  %vm459_vm1 = vmor %vm457_vm15, %vm458_vm13  ;;  %1943 = vtanh.f32 %v2495_v57  ;;  %vm477_vm5 = vweird.f32 %v471_v13  ;;  %v484_v46 = vor.u32 1.1754944e-38, %v483_v40  ;;  %3201 = vst [vmem:[#allocation21_spill] sm:$0xff] %v2567_v9  ;;  %v2591_v17 = vld [vmem:[#allocation7 + $0x110] sm:$0xff]  ;;  %800 = vmatpush.msrb.mxu0 %v2587_v15 }
 0x166   :  { %v454_v20 = vsub.f32 1.0, %v453_v18  ;;  %vm482_vm7 = vcmp.eq.f32.partialorder %v481_v43, 8.507059e+37  ;;  %819 = vmatpush.msrb.mxu1 %v2577_v12  ;;  %v2595_v18 = vld [vmem:[#allocation7 + $0x118] sm:$0xff]  ;;  %v2651_v43 = vld [vmem:[#allocation7 + $0x70] sm:$0xff] }
 0x167   :  { %v440_v23 = vmul.f32 %v1936_v14, %v439_v19  ;;  %3205 = vst [vmem:[#allocation25_spill] sm:$0xff] %v2595_v18  ;;  %v2599_v19 = vld [vmem:[#allocation7 + $0xe0] sm:$0xff] }
 0x168   :  { %v455_v25 = vmul.f32 %v1938_v16, %v454_v20  ;;  %v2601_v20 = vld [vmem:[#allocation7 + $0xe8] sm:$0xff]  ;;  %801 = vmatpush.msrb.mxu0 %v2599_v19 }
 0x169   :  { %v1940_v27 = vpop.eup %1939  ;;  %v441_v28 = vadd.f32 %v1936_v14, %v440_v23  ;;  %v2611_v23 = vld [vmem:[#allocation7 + $0xc0] sm:$0xff] }
 0x16a   :  { %v456_v30 = vadd.f32 %v1938_v16, %v455_v25  ;;  %v473_v31 = vmul.f32 %v1940_v27, %v471_v13  ;;  %v1942_v34 = vpop.eup %1941  ;;  %vm478_vm4 = vweird.f32 %v1940_v27  ;;  %v2579_v13 = vld [vmem:[#allocation7 + $0x130] sm:$0xff]  ;;  %802 = vmatpush.msrb.mxu0 %v2611_v23 }
 0x16b   :  { %v445_v33 = vsel %vm444_vm0, %v1936_v14, %v441_v28  ;;  %vm479_vm6 = vmor %vm477_vm5, %vm478_vm4  ;;  %v1944_v48 = vpop.eup %1943  ;;  %v2583_v14 = vld [vmem:[#allocation7 + $0x138] sm:$0xff]  ;;  %v2615_v25 = vld [vmem:[#allocation7 + $0xd0] sm:$0xff] }
 0x16c   :  { %v450_v35 = vsel %vm447_vm2, %v449_v29, %v445_v33  ;;  %v460_v36 = vsel %vm459_vm1, %v1938_v16, %v456_v30  ;;  %v474_v37 = vsub.f32 1.0, %v473_v31  ;;  %859 = vmatpush.msrb.mxu3 %v2583_v14  ;;  %v2589_v16 = vld [vmem:[#allocation7 + $0x108] sm:$0xff]  ;;  %v2627_v29 = vld [vmem:[#allocation7 + $0xb0] sm:$0xff]  ;;  %v501_v30 = vld [vmem:[#allocation4 + $0x40] sm:$0xff] }
 0x16d   :  { %v465_v38 = vsel %vm462_vm3, %v464_v32, %v460_v36  ;;  %v488_v39 = vmul.f32 %v1942_v34, %v450_v35  ;;  %3204 = vst [vmem:[#allocation24_spill] sm:$0xff] %v2589_v16  ;;  %820 = vmatpush.msrb.mxu1 %v2589_v16  ;;  %v2625_v28 = vld [vmem:[#allocation7 + $0xa8] sm:$0xff]  ;;  %v2631_v32 = vld [vmem:[#allocation7 + $0xb8] sm:$0xff]  ;;  %v2635_v33 = vld [vmem:[#allocation7 + $0x80] sm:$0xff] }
 0x16e   :  { %v487_v41 = vmul.f32 %v465_v38, %v2495_v57  ;;  %v475_v42 = vmul.f32 %v1940_v27, %v474_v37  ;;  %v2519_v57 = vld [vmem:[#allocation7 + $0x1d0] sm:$0xff]  ;;  %860 = vmatpush.msrb.mxu3 %v2595_v18  ;;  %v502_v31 = vld [vmem:[#allocation4 + $0x48] sm:$0xff]  ;;  %v2643_v38 = vld [vmem:[#allocation7 + $0x98] sm:$0xff] }
 0x16f   :  { %834 = vmatpush.msrb.mxu2 %v2519_v57  ;;  %821 = vmatpush.msrb.mxu1 %v2601_v20  ;;  %v2637_v34 = vld [vmem:[#allocation7 + $0x88] sm:$0xff]  ;;  %v2639_v35 = vld [vmem:[#allocation7 + $0x90] sm:$0xff] }
 0x170   :  { %v2500_v44 = vadd.f32 %v488_v39, %v487_v41  ;;  %v476_v45 = vadd.f32 %v1940_v27, %v475_v42  ;;  %861 = vmatpush.msrb.mxu3 %v2607_v22  ;;  %v2647_v41 = vld [vmem:[#allocation7 + $0x60] sm:$0xff]  ;;  %v2649_v42 = vld [vmem:[#allocation7 + $0x68] sm:$0xff] }
 0x171   :  { %835 = vmatpush.msrb.mxu2 %v2531_v61  ;;  %822 = vmatpush.msrb.mxu1 %v2613_v24 }
 0x172   :  { %497 = vst [vmem:[#allocation10 + $0x8] sm:$0xff] %v2500_v44  ;;  %v480_v47 = vsel %vm479_vm6, %v1940_v27, %v476_v45  ;;  %862 = vmatpush.msrb.mxu3 %v2619_v26  ;;  %v2623_v27 = vld [vmem:[#allocation7 + $0xa0] sm:$0xff]  ;;  %v2655_v45 = vld [vmem:[#allocation7 + $0x78] sm:$0xff] }
 0x173   :  { %v485_v49 = vsel %vm482_vm7, %v484_v46, %v480_v47  ;;  %836 = vmatpush.msrb.mxu2 %v2543_v1  ;;  %803 = vmatpush.msrb.mxu0 %v2623_v27  ;;  %3209 = vst [vmem:[#allocation29_spill] sm:$0xff] %v2655_v45 }
 0x174   :  { %v491_v50 = vmul.f32 %v1944_v48, %v485_v49  ;;  %823 = vmatpush.msrb.mxu1 %v2625_v28  ;;  %863 = vmatpush.msrb.mxu3 %v2631_v32  ;;  %v504_v48 = vld [vmem:[#allocation4 + $0x58] sm:$0xff]  ;;  %v2659_v49 = vld [vmem:[#allocation7 + $0x40] sm:$0xff] }
 0x175   :  { %837 = vmatpush.msrb.mxu2 %v2555_v5  ;;  %804 = vmatpush.msrb.mxu0 %v2635_v33  ;;  %3210 = vst [vmem:[#allocation30_spill] sm:$0xff] %v2659_v49 }
 0x176   :  { %495 = vst [vmem:[#allocation9 + $0x8] sm:$0xff] %v491_v50  ;;  %585 = vmatmul.f32.vlgmr.msra.gmra.mxu0 %v491_v50  ;;  %605 = vmatmul.f32.vlgmr.msra.gmra.mxu1 %v491_v50 }
 0x177   :  { %625 = vmatmul.f32.vlgmr.msra.gmra.mxu2 %v491_v50  ;;  %645 = vmatmul.f32.vlgmr.msra.gmra.mxu3 %v491_v50  ;;  %v2661_v50 = vld [vmem:[#allocation7 + $0x48] sm:$0xff] }
 0x178   :  { %838 = vmatpush.msrb.mxu2 %v2567_v9  ;;  %824 = vmatpush.msrb.mxu1 %v2637_v34  ;;  %3211 = vst [vmem:[#allocation31_spill] sm:$0xff] %v2661_v50 }
 0x179   :  { %864 = vmatpush.msrb.mxu3 %v2643_v38  ;;  %805 = vmatpush.msrb.mxu0 %v2647_v41 }
 0x17a   :  { %839 = vmatpush.msrb.mxu2 %v2579_v13  ;;  %825 = vmatpush.msrb.mxu1 %v2649_v42 }
 0x17b   :  { %865 = vmatpush.msrb.mxu3 %v2655_v45  ;;  %806 = vmatpush.msrb.mxu0 %v2659_v49  ;;  %v2683_v49 = vld [vmem:[#allocation7 + $0x8] sm:$0xff] }
 0x17c   :  { %840 = vmatpush.msrb.mxu2 %v2591_v17  ;;  %826 = vmatpush.msrb.mxu1 %v2661_v50  ;;  %v2681_v50 = vld [vmem:[#allocation7] sm:$0xff] }
 0x17e   :  { %841 = vmatpush.msrb.mxu2 %v2603_v21 }
 0x180   :  { %842 = vmatpush.msrb.mxu2 %v2615_v25 }
 0x182   :  { %843 = vmatpush.msrb.mxu2 %v2627_v29 }
 0x184   :  { %844 = vmatpush.msrb.mxu2 %v2639_v35 }
 0x186   :  { %845 = vmatpush.msrb.mxu2 %v2651_v43 }
 0x1f3   :  { %v586_v36 = vpop.f32.mrf.mxu0  ;;  %v606_v37 = vpop.f32.mrf.mxu1 }
 0x1f4   :  { %v649_v39 = vadd.f32 %v586_v36, %v501_v30  ;;  %v650_v40 = vadd.f32 %v606_v37, %v502_v31  ;;  %v2665_v30 = vld [vmem:[#allocation7 + $0x50] sm:$0xff]  ;;  %v2667_v31 = vld [vmem:[#allocation7 + $0x58] sm:$0xff]  ;;  %v2669_v36 = vld [vmem:[#allocation7 + $0x20] sm:$0xff] }
 0x1f5   :  { %3212 = vst [vmem:[#allocation32_spill] sm:$0xff] %v2665_v30  ;;  %846 = vmatpush.msrb.mxu2 %v2665_v30  ;;  %866 = vmatpush.msrb.mxu3 %v2667_v31  ;;  %v2673_v37 = vld [vmem:[#allocation7 + $0x28] sm:$0xff] }
 0x1f6   :  { %v1886_v46 = vmul.f32 -1.442695, %v649_v39  ;;  %v1887_v47 = vmul.f32 -1.442695, %v650_v40  ;;  %3213 = vst [vmem:[#allocation33_spill] sm:$0xff] %v2667_v31  ;;  %v2675_v39 = vld [vmem:[#allocation7 + $0x30] sm:$0xff]  ;;  %807 = vmatpush.msrb.mxu0 %v2669_v36  ;;  %827 = vmatpush.msrb.mxu1 %v2673_v37 }
 0x1f7   :  { %3214 = vst [vmem:[#allocation34_spill] sm:$0xff] %v2673_v37  ;;  %v2677_v40 = vld [vmem:[#allocation7 + $0x38] sm:$0xff]  ;;  %847 = vmatpush.msrb.mxu2 %v2675_v39 }
 0x1f8   :  { %1945 = vpow2.f32 %v1886_v46  ;;  %3215 = vst [vmem:[#allocation35_spill] sm:$0xff] %v2677_v40  ;;  %v2685_v46 = vld [vmem:[#allocation7 + $0x10] sm:$0xff]  ;;  %867 = vmatpush.msrb.mxu3 %v2677_v40  ;;  %v2689_v31 = vld [vmem:[#allocation7 + $0x18] sm:$0xff]  ;;  %808 = vmatpush.msrb.mxu0 %v2681_v50 }
 0x1f9   :  { %1947 = vpow2.f32 %v1887_v47  ;;  %828 = vmatpush.msrb.mxu1 %v2683_v49  ;;  %848 = vmatpush.msrb.mxu2 %v2685_v46 }
 0x1fa   :  { %v646_v30 = vpop.f32.mrf.mxu3  ;;  %868 = vmatpush.msrb.mxu3 %v2689_v31  ;;  %1017 = vmatpush.msra.mxu0 %v2503_v51 }
 0x1fb   :  { %v652_v45 = vadd.f32 %v646_v30, %v504_v48  ;;  %1037 = vmatpush.msra.mxu1 %v2505_v52  ;;  %1057 = vmatpush.msra.mxu2 %v2507_v53 }
 0x1fc   :  { %1077 = vmatpush.msra.mxu3 %v2511_v54  ;;  %1018 = vmatpush.msra.mxu0 %v2515_v55 }
 0x1fd   :  { %v1888_v47 = vmul.f32 -1.442695, %v652_v45  ;;  %1038 = vmatpush.msra.mxu1 %v2517_v56  ;;  %1058 = vmatpush.msra.mxu2 %v2519_v57  ;;  %v503_v45 = vld [vmem:[#allocation4 + $0x50] sm:$0xff] }
 0x1fe   :  { %v1946_v37 = vpop.eup %1945  ;;  %1078 = vmatpush.msra.mxu3 %v2523_v58  ;;  %1019 = vmatpush.msra.mxu0 %v2527_v59 }
 0x1ff   :  { %v1948_v40 = vpop.eup %1947  ;;  %v2699_v48 = vadd.f32 1.0, %v1946_v37  ;;  %1949 = vpow2.f32 %v1888_v47  ;;  %1039 = vmatpush.msra.mxu1 %v2529_v60  ;;  %1059 = vmatpush.msra.mxu2 %v2531_v61  ;;  %v626_v37 = vpop.f32.mrf.mxu2 }
 0x200   :  { %v2703_v30 = vadd.f32 1.0, %v1948_v40  ;;  %1079 = vmatpush.msra.mxu3 %v2535_v62  ;;  %1020 = vmatpush.msra.mxu0 %v2539_v63  ;;  %v651_v62 = vadd.f32 %v626_v37, %v503_v45 }
 0x201   :  { %1951 = vrcp.f32 %v2699_v48  ;;  %1040 = vmatpush.msra.mxu1 %v2541_v0  ;;  %1060 = vmatpush.msra.mxu2 %v2543_v1  ;;  %vm666_vm10 = vweird.f32 %v2699_v48 }
 0x202   :  { %1953 = vrcp.f32 %v2703_v30  ;;  %1080 = vmatpush.msra.mxu3 %v2547_v2  ;;  %1021 = vmatpush.msra.mxu0 %v2551_v3  ;;  %vm681_vm11 = vweird.f32 %v2703_v30 }
 0x203   :  { %1041 = vmatpush.msra.mxu1 %v2553_v4  ;;  %1061 = vmatpush.msra.mxu2 %v2555_v5 }
 0x204   :  { %1081 = vmatpush.msra.mxu3 %v2559_v6  ;;  %1022 = vmatpush.msra.mxu0 %v2563_v7 }
 0x205   :  { %v1950_v40 = vpop.eup %1949  ;;  %1042 = vmatpush.msra.mxu1 %v2565_v8  ;;  %1062 = vmatpush.msra.mxu2 %v2567_v9  ;;  %v672_v8 = vand.u32 2147483648, %v2699_v48 }
 0x206   :  { %v2719_v47 = vadd.f32 1.0, %v1950_v40  ;;  %1082 = vmatpush.msra.mxu3 %v2571_v10  ;;  %1023 = vmatpush.msra.mxu0 %v2575_v11  ;;  %v687_v10 = vand.u32 2147483648, %v2703_v30  ;;  %v670_v11 = vand.u32 2147483647, %v2699_v48 }
 0x207   :  { %v1952_v63 = vpop.eup %1951  ;;  %1043 = vmatpush.msra.mxu1 %v2577_v12  ;;  %1063 = vmatpush.msra.mxu2 %v2579_v13 }
 0x208   :  { %v1954_v1 = vpop.eup %1953  ;;  %v662_v2 = vmul.f32 %v1952_v63, %v2699_v48  ;;  %1955 = vrcp.f32 %v2719_v47  ;;  %1083 = vmatpush.msra.mxu3 %v2583_v14  ;;  %1024 = vmatpush.msra.mxu0 %v2587_v15  ;;  %vm667_vm8 = vweird.f32 %v1952_v63  ;;  %vm671_vm14 = vcmp.eq.f32.partialorder %v670_v11, 8.507059e+37 }
 0x209   :  { %v677_v40 = vmul.f32 %v1954_v1, %v2703_v30  ;;  %1957 = vtanh.f32 %v651_v62  ;;  %1044 = vmatpush.msra.mxu1 %v2589_v16  ;;  %1064 = vmatpush.msra.mxu2 %v2591_v17  ;;  %vm682_vm9 = vweird.f32 %v1954_v1  ;;  %vm668_vm12 = vmor %vm666_vm10, %vm667_vm8  ;;  %vm701_vm1 = vweird.f32 %v2719_v47 }
 0x20a   :  { %v663_v45 = vsub.f32 1.0, %v662_v2  ;;  %1084 = vmatpush.msra.mxu3 %v2595_v18  ;;  %1025 = vmatpush.msra.mxu0 %v2599_v19  ;;  %vm683_vm13 = vmor %vm681_vm11, %vm682_vm9  ;;  %1959 = vtanh.f32 %v2500_v44 }
 0x20b   :  { %v678_v37 = vsub.f32 1.0, %v677_v40  ;;  %v685_v40 = vand.u32 2147483647, %v2703_v30  ;;  %1045 = vmatpush.msra.mxu1 %v2601_v20  ;;  %1065 = vmatpush.msra.mxu2 %v2603_v21 }
 0x20c   :  { %v664_v9 = vmul.f32 %v1952_v63, %v663_v45  ;;  %1085 = vmatpush.msra.mxu3 %v2607_v22  ;;  %v673_v45 = vor.u32 1.1754944e-38, %v672_v8  ;;  %1026 = vmatpush.msra.mxu0 %v2611_v23 }
 0x20d   :  { %v679_v2 = vmul.f32 %v1954_v1, %v678_v37  ;;  %1046 = vmatpush.msra.mxu1 %v2613_v24  ;;  %1066 = vmatpush.msra.mxu2 %v2615_v25  ;;  %vm686_vm15 = vcmp.eq.f32.partialorder %v685_v40, 8.507059e+37  ;;  %v3217_v40 = vld [vmem:[#allocation30_spill] sm:$0xff] }
 0x20e   :  { %v1956_v62 = vpop.eup %1955  ;;  %v665_v16 = vadd.f32 %v1952_v63, %v664_v9  ;;  %v688_v9 = vor.u32 1.1754944e-38, %v687_v10  ;;  %1086 = vmatpush.msra.mxu3 %v2619_v26  ;;  %1027 = vmatpush.msra.mxu0 %v2623_v27 }
 0x20f   :  { %v680_v37 = vadd.f32 %v1954_v1, %v679_v2  ;;  %v697_v18 = vmul.f32 %v1956_v62, %v2719_v47  ;;  %v1958_v30 = vpop.eup %1957  ;;  %1047 = vmatpush.msra.mxu1 %v2625_v28  ;;  %1067 = vmatpush.msra.mxu2 %v2627_v29  ;;  %vm702_vm0 = vweird.f32 %v1956_v62 }
 0x210   :  { %v669_v48 = vsel %vm668_vm12, %v1952_v63, %v665_v16  ;;  %v707_v63 = vand.u32 2147483648, %v2719_v47  ;;  %1087 = vmatpush.msra.mxu3 %v2631_v32  ;;  %1028 = vmatpush.msra.mxu0 %v2635_v33  ;;  %vm703_vm2 = vmor %vm701_vm1, %vm702_vm0 }
 0x211   :  { %v674_v22 = vsel %vm671_vm14, %v673_v45, %v669_v48  ;;  %v684_v21 = vsel %vm683_vm13, %v1954_v1, %v680_v37  ;;  %v698_v8 = vsub.f32 1.0, %v697_v18  ;;  %v705_v1 = vand.u32 2147483647, %v2719_v47  ;;  %1048 = vmatpush.msra.mxu1 %v2637_v34  ;;  %1068 = vmatpush.msra.mxu2 %v2639_v35  ;;  %v1960_v47 = vpop.eup %1959  ;;  %v3219_v37 = vld [vmem:[#allocation32_spill] sm:$0xff] }
 0x212   :  { %v689_v2 = vsel %vm686_vm15, %v688_v9, %v684_v21  ;;  %v712_v24 = vmul.f32 %v1958_v30, %v674_v22  ;;  %1088 = vmatpush.msra.mxu3 %v2643_v38  ;;  %1029 = vmatpush.msra.mxu0 %v2647_v41  ;;  %v3216_v21 = vld [vmem:[#allocation29_spill] sm:$0xff]  ;;  %v3221_v30 = vld [vmem:[#allocation34_spill] sm:$0xff] }
 0x213   :  { %v711_v10 = vmul.f32 %v689_v2, %v2500_v44  ;;  %v699_v11 = vmul.f32 %v1956_v62, %v698_v8  ;;  %1049 = vmatpush.msra.mxu1 %v2649_v42  ;;  %v708_v44 = vor.u32 1.1754944e-38, %v707_v63  ;;  %1069 = vmatpush.msra.mxu2 %v2651_v43  ;;  %vm706_vm3 = vcmp.eq.f32.partialorder %v705_v1, 8.507059e+37  ;;  %v3220_v9 = vld [vmem:[#allocation33_spill] sm:$0xff]  ;;  %v3222_v8 = vld [vmem:[#allocation35_spill] sm:$0xff] }
 0x214   :  { %1089 = vmatpush.msra.mxu3 %v3216_v21  ;;  %1030 = vmatpush.msra.mxu0 %v3217_v40 }
 0x215   :  { %v2767_v16 = vadd.f32 %v712_v24, %v711_v10  ;;  %v700_v18 = vadd.f32 %v1956_v62, %v699_v11  ;;  %v3218_v24 = vld [vmem:[#allocation31_spill] sm:$0xff]  ;;  %1070 = vmatpush.msra.mxu2 %v3219_v37 }
 0x216   :  { %1050 = vmatpush.msra.mxu1 %v3218_v24  ;;  %1090 = vmatpush.msra.mxu3 %v3220_v9 }
 0x217   :  { %721 = vst [vmem:[#allocation10 + $0x10] sm:$0xff] %v2767_v16  ;;  %v704_v22 = vsel %vm703_vm2, %v1956_v62, %v700_v18  ;;  %1031 = vmatpush.msra.mxu0 %v2669_v36  ;;  %1071 = vmatpush.msra.mxu2 %v2675_v39 }
 0x218   :  { %v709_v45 = vsel %vm706_vm3, %v708_v44, %v704_v22  ;;  %1051 = vmatpush.msra.mxu1 %v3221_v30  ;;  %1091 = vmatpush.msra.mxu3 %v3222_v8 }
 0x219   :  { %v715_v48 = vmul.f32 %v1960_v47, %v709_v45  ;;  %1032 = vmatpush.msra.mxu0 %v2681_v50  ;;  %1072 = vmatpush.msra.mxu2 %v2685_v46 }
 0x21a   :  { %1052 = vmatpush.msra.mxu1 %v2683_v49  ;;  %1092 = vmatpush.msra.mxu3 %v2689_v31 }
 0x21b   :  { %719 = vst [vmem:[#allocation9 + $0x10] sm:$0xff] %v715_v48  ;;  %809 = vmatmul.f32.vlgmr.msrb.gmra.mxu0 %v715_v48  ;;  %829 = vmatmul.f32.vlgmr.msrb.gmra.mxu1 %v715_v48 }
 0x21c   :  { %849 = vmatmul.f32.vlgmr.msrb.gmra.mxu2 %v715_v48  ;;  %869 = vmatmul.f32.vlgmr.msrb.gmra.mxu3 %v715_v48 }
 0x21d   :  { %1241 = vmatpush.msrb.mxu0 %v2503_v51  ;;  %1261 = vmatpush.msrb.mxu1 %v2505_v52  ;;  %v3223_v51 = vld [vmem:[#allocation16_spill] sm:$0xff]  ;;  %v3224_v52 = vld [vmem:[#allocation17_spill] sm:$0xff] }
 0x21e   :  { %1281 = vmatpush.msrb.mxu2 %v2507_v53  ;;  %1301 = vmatpush.msrb.mxu3 %v2511_v54  ;;  %v3225_v53 = vld [vmem:[#allocation18_spill] sm:$0xff]  ;;  %v3226_v54 = vld [vmem:[#allocation19_spill] sm:$0xff] }
 0x21f   :  { %1242 = vmatpush.msrb.mxu0 %v2515_v55  ;;  %1262 = vmatpush.msrb.mxu1 %v2517_v56  ;;  %v3227_v55 = vld [vmem:[#allocation20_spill] sm:$0xff]  ;;  %v3228_v56 = vld [vmem:[#allocation21_spill] sm:$0xff] }
 0x220   :  { %1282 = vmatpush.msrb.mxu2 %v2519_v57  ;;  %1302 = vmatpush.msrb.mxu3 %v2523_v58  ;;  %v3229_v57 = vld [vmem:[#allocation22_spill] sm:$0xff]  ;;  %v3230_v58 = vld [vmem:[#allocation23_spill] sm:$0xff] }
 0x221   :  { %1243 = vmatpush.msrb.mxu0 %v2527_v59  ;;  %1263 = vmatpush.msrb.mxu1 %v2529_v60  ;;  %v3231_v59 = vld [vmem:[#allocation24_spill] sm:$0xff]  ;;  %v3232_v60 = vld [vmem:[#allocation25_spill] sm:$0xff] }
 0x222   :  { %1283 = vmatpush.msrb.mxu2 %v2531_v61  ;;  %1303 = vmatpush.msrb.mxu3 %v3223_v51  ;;  %v3233_v61 = vld [vmem:[#allocation26_spill] sm:$0xff] }
 0x223   :  { %1244 = vmatpush.msrb.mxu0 %v3224_v52  ;;  %1264 = vmatpush.msrb.mxu1 %v2541_v0  ;;  %v3234_v0 = vld [vmem:[#allocation27_spill] sm:$0xff] }
 0x224   :  { %1284 = vmatpush.msrb.mxu2 %v3225_v53  ;;  %1304 = vmatpush.msrb.mxu3 %v3226_v54 }
 0x225   :  { %1245 = vmatpush.msrb.mxu0 %v2551_v3  ;;  %1265 = vmatpush.msrb.mxu1 %v2553_v4  ;;  %v3235_v3 = vld [vmem:[#allocation28_spill] sm:$0xff] }
 0x226   :  { %1285 = vmatpush.msrb.mxu2 %v2555_v5  ;;  %1305 = vmatpush.msrb.mxu3 %v2559_v6  ;;  %v725_v4 = vld [vmem:[#allocation4 + $0x60] sm:$0xff]  ;;  %v726_v5 = vld [vmem:[#allocation4 + $0x68] sm:$0xff] }
 0x227   :  { %1246 = vmatpush.msrb.mxu0 %v2563_v7  ;;  %1266 = vmatpush.msrb.mxu1 %v3227_v55 }
 0x228   :  { %1286 = vmatpush.msrb.mxu2 %v3228_v56  ;;  %1306 = vmatpush.msrb.mxu3 %v3229_v57 }
 0x229   :  { %1247 = vmatpush.msrb.mxu0 %v3230_v58  ;;  %1267 = vmatpush.msrb.mxu1 %v2577_v12  ;;  %v950_v58 = vld [vmem:[#allocation4 + $0x88] sm:$0xff] }
 0x22a   :  { %1287 = vmatpush.msrb.mxu2 %v2579_v13  ;;  %1307 = vmatpush.msrb.mxu3 %v2583_v14 }
 0x22b   :  { %1248 = vmatpush.msrb.mxu0 %v2587_v15  ;;  %1268 = vmatpush.msrb.mxu1 %v3231_v59 }
 0x22c   :  { %1288 = vmatpush.msrb.mxu2 %v2591_v17  ;;  %1308 = vmatpush.msrb.mxu3 %v3232_v60  ;;  %v728_v17 = vld [vmem:[#allocation4 + $0x78] sm:$0xff] }
 0x22d   :  { %1249 = vmatpush.msrb.mxu0 %v2599_v19  ;;  %1269 = vmatpush.msrb.mxu1 %v2601_v20 }
 0x22e   :  { %1289 = vmatpush.msrb.mxu2 %v3233_v61  ;;  %1309 = vmatpush.msrb.mxu3 %v3234_v0 }
 0x22f   :  { %1250 = vmatpush.msrb.mxu0 %v2611_v23  ;;  %1270 = vmatpush.msrb.mxu1 %v3235_v3 }
 0x230   :  { %1290 = vmatpush.msrb.mxu2 %v2615_v25  ;;  %1310 = vmatpush.msrb.mxu3 %v2619_v26 }
 0x231   :  { %1251 = vmatpush.msrb.mxu0 %v2623_v27  ;;  %1271 = vmatpush.msrb.mxu1 %v2625_v28 }
 0x232   :  { %1291 = vmatpush.msrb.mxu2 %v2627_v29  ;;  %1311 = vmatpush.msrb.mxu3 %v2631_v32  ;;  %v727_v29 = vld [vmem:[#allocation4 + $0x70] sm:$0xff] }
 0x233   :  { %1252 = vmatpush.msrb.mxu0 %v2635_v33  ;;  %1272 = vmatpush.msrb.mxu1 %v2637_v34 }
 0x234   :  { %1292 = vmatpush.msrb.mxu2 %v2639_v35  ;;  %1312 = vmatpush.msrb.mxu3 %v2643_v38 }
 0x235   :  { %1253 = vmatpush.msrb.mxu0 %v2647_v41  ;;  %1273 = vmatpush.msrb.mxu1 %v2649_v42 }
 0x236   :  { %1293 = vmatpush.msrb.mxu2 %v2651_v43  ;;  %1313 = vmatpush.msrb.mxu3 %v3216_v21 }
 0x237   :  { %1254 = vmatpush.msrb.mxu0 %v3217_v40  ;;  %1274 = vmatpush.msrb.mxu1 %v3218_v24 }
 0x238   :  { %1294 = vmatpush.msrb.mxu2 %v3219_v37  ;;  %1314 = vmatpush.msrb.mxu3 %v3220_v9 }
 0x239   :  { %1255 = vmatpush.msrb.mxu0 %v2669_v36  ;;  %1275 = vmatpush.msrb.mxu1 %v3221_v30 }
 0x23a   :  { %1295 = vmatpush.msrb.mxu2 %v2675_v39  ;;  %1315 = vmatpush.msrb.mxu3 %v3222_v8 }
 0x23b   :  { %1256 = vmatpush.msrb.mxu0 %v2681_v50  ;;  %1276 = vmatpush.msrb.mxu1 %v2683_v49 }
 0x23c   :  { %1296 = vmatpush.msrb.mxu2 %v2685_v46  ;;  %1316 = vmatpush.msrb.mxu3 %v2689_v31 }
 0x298   :  { %v810_v6 = vpop.f32.mrf.mxu0  ;;  %v830_v7 = vpop.f32.mrf.mxu1 }
 0x299   :  { %v873_v12 = vadd.f32 %v810_v6, %v725_v4  ;;  %v874_v13 = vadd.f32 %v830_v7, %v726_v5  ;;  %v952_v5 = vld [vmem:[#allocation4 + $0x98] sm:$0xff] }
 0x29b   :  { %v1889_v14 = vmul.f32 -1.442695, %v873_v12  ;;  %v1890_v15 = vmul.f32 -1.442695, %v874_v13 }
 0x29d   :  { %1961 = vpow2.f32 %v1889_v14 }
 0x29e   :  { %1963 = vpow2.f32 %v1890_v15 }
 0x29f   :  { %v870_v19 = vpop.f32.mrf.mxu3  ;;  %v850_v32 = vpop.f32.mrf.mxu2 }
 0x2a0   :  { %v876_v20 = vadd.f32 %v870_v19, %v728_v17  ;;  %v875_v38 = vadd.f32 %v850_v32, %v727_v29  ;;  %v951_v19 = vld [vmem:[#allocation4 + $0x90] sm:$0xff] }
 0x2a2   :  { %v1891_v23 = vmul.f32 -1.442695, %v876_v20 }
 0x2a3   :  { %v1962_v25 = vpop.eup %1961 }
 0x2a4   :  { %v1964_v26 = vpop.eup %1963  ;;  %v883_v27 = vadd.f32 1.0, %v1962_v25  ;;  %1965 = vpow2.f32 %v1891_v23 }
 0x2a5   :  { %v884_v28 = vadd.f32 1.0, %v1964_v26 }
 0x2a6   :  { %1967 = vrcp.f32 %v883_v27  ;;  %v896_v31 = vand.u32 2147483648, %v883_v27  ;;  %v894_v46 = vand.u32 2147483647, %v883_v27  ;;  %vm890_vm6 = vweird.f32 %v883_v27 }
 0x2a7   :  { %1969 = vrcp.f32 %v884_v28  ;;  %v911_v36 = vand.u32 2147483648, %v884_v28  ;;  %v909_v2 = vand.u32 2147483647, %v884_v28  ;;  %vm905_vm7 = vweird.f32 %v884_v28 }
 0x2a8   :  { %v897_v11 = vor.u32 1.1754944e-38, %v896_v31  ;;  %vm895_vm10 = vcmp.eq.f32.partialorder %v894_v46, 8.507059e+37 }
 0x2a9   :  { %v912_v44 = vor.u32 1.1754944e-38, %v911_v36  ;;  %vm910_vm11 = vcmp.eq.f32.partialorder %v909_v2, 8.507059e+37 }
 0x2aa   :  { %v1966_v33 = vpop.eup %1965 }
 0x2ab   :  { %v919_v34 = vadd.f32 1.0, %v1966_v33 }
 0x2ac   :  { %v1968_v35 = vpop.eup %1967 }
 0x2ad   :  { %v1970_v41 = vpop.eup %1969  ;;  %v886_v42 = vmul.f32 %v1968_v35, %v883_v27  ;;  %1971 = vrcp.f32 %v919_v34  ;;  %vm891_vm4 = vweird.f32 %v1968_v35  ;;  %v931_v9 = vand.u32 2147483648, %v919_v34 }
 0x2ae   :  { %v901_v43 = vmul.f32 %v1970_v41, %v884_v28  ;;  %1973 = vtanh.f32 %v875_v38  ;;  %vm906_vm5 = vweird.f32 %v1970_v41  ;;  %vm892_vm8 = vmor %vm890_vm6, %vm891_vm4  ;;  %v929_v8 = vand.u32 2147483647, %v919_v34 }
 0x2af   :  { %v887_v49 = vsub.f32 1.0, %v886_v42  ;;  %vm907_vm9 = vmor %vm905_vm7, %vm906_vm5  ;;  %1975 = vtanh.f32 %v2767_v16  ;;  %vm925_vm13 = vweird.f32 %v919_v34  ;;  %v932_v53 = vor.u32 1.1754944e-38, %v931_v9 }
 0x2b0   :  { %v902_v50 = vsub.f32 1.0, %v901_v43  ;;  %vm930_vm15 = vcmp.eq.f32.partialorder %v929_v8, 8.507059e+37 }
 0x2b1   :  { %v888_v39 = vmul.f32 %v1968_v35, %v887_v49 }
 0x2b2   :  { %v903_v62 = vmul.f32 %v1970_v41, %v902_v50 }
 0x2b3   :  { %v1972_v63 = vpop.eup %1971  ;;  %v889_v10 = vadd.f32 %v1968_v35, %v888_v39 }
 0x2b4   :  { %v904_v1 = vadd.f32 %v1970_v41, %v903_v62  ;;  %v921_v18 = vmul.f32 %v1972_v63, %v919_v34  ;;  %v1974_v22 = vpop.eup %1973  ;;  %vm926_vm12 = vweird.f32 %v1972_v63 }
 0x2b5   :  { %v893_v21 = vsel %vm892_vm8, %v1968_v35, %v889_v10  ;;  %vm927_vm14 = vmor %vm925_vm13, %vm926_vm12  ;;  %v1976_v55 = vpop.eup %1975 }
 0x2b6   :  { %v898_v40 = vsel %vm895_vm10, %v897_v11, %v893_v21  ;;  %v908_v24 = vsel %vm907_vm9, %v1970_v41, %v904_v1  ;;  %v922_v47 = vsub.f32 1.0, %v921_v18 }
 0x2b7   :  { %v913_v45 = vsel %vm910_vm11, %v912_v44, %v908_v24  ;;  %v936_v37 = vmul.f32 %v1974_v22, %v898_v40 }
 0x2b8   :  { %v935_v48 = vmul.f32 %v913_v45, %v2767_v16  ;;  %v923_v30 = vmul.f32 %v1972_v63, %v922_v47  ;;  %v949_v16 = vld [vmem:[#allocation4 + $0x80] sm:$0xff] }
 0x2ba   :  { %v2853_v51 = vadd.f32 %v936_v37, %v935_v48  ;;  %v924_v52 = vadd.f32 %v1972_v63, %v923_v30 }
 0x2bc   :  { %945 = vst [vmem:[#allocation10 + $0x18] sm:$0xff] %v2853_v51  ;;  %v928_v54 = vsel %vm927_vm14, %v1972_v63, %v924_v52  ;;  %v2863_v52 = vld [vmem:[#allocation7 + $0x1e8] sm:$0xff] }
 0x2bd   :  { %v933_v56 = vsel %vm930_vm15, %v932_v53, %v928_v54  ;;  %v2865_v53 = vld [vmem:[#allocation7 + $0x1f0] sm:$0xff]  ;;  %v2869_v54 = vld [vmem:[#allocation7 + $0x1f8] sm:$0xff] }
 0x2be   :  { %v939_v57 = vmul.f32 %v1976_v55, %v933_v56  ;;  %v2873_v55 = vld [vmem:[#allocation7 + $0x1c0] sm:$0xff]  ;;  %v2875_v56 = vld [vmem:[#allocation7 + $0x1c8] sm:$0xff] }
 0x2c0   :  { %943 = vst [vmem:[#allocation9 + $0x18] sm:$0xff] %v939_v57  ;;  %1033 = vmatmul.f32.vlgmr.msra.gmra.mxu0 %v939_v57  ;;  %1053 = vmatmul.f32.vlgmr.msra.gmra.mxu1 %v939_v57 }
 0x2c1   :  { %1073 = vmatmul.f32.vlgmr.msra.gmra.mxu2 %v939_v57  ;;  %1093 = vmatmul.f32.vlgmr.msra.gmra.mxu3 %v939_v57  ;;  %v2877_v57 = vld [vmem:[#allocation7 + $0x1d0] sm:$0xff] }
 0x2c2   :  { %1485 = vmatpush.msra.mxu1 %v2863_v52  ;;  %1505 = vmatpush.msra.mxu2 %v2865_v53 }
 0x2c3   :  { %1525 = vmatpush.msra.mxu3 %v2869_v54 }
 0x2c4   :  { %1486 = vmatpush.msra.mxu1 %v2875_v56  ;;  %1506 = vmatpush.msra.mxu2 %v2877_v57 }
 0x33d   :  { %v1034_v59 = vpop.f32.mrf.mxu0  ;;  %v1054_v60 = vpop.f32.mrf.mxu1 }
 0x33e   :  { %v1097_v61 = vadd.f32 %v1034_v59, %v949_v16  ;;  %v1098_v0 = vadd.f32 %v1054_v60, %v950_v58  ;;  %v2881_v16 = vld [vmem:[#allocation7 + $0x1d8] sm:$0xff]  ;;  %v2885_v58 = vld [vmem:[#allocation7 + $0x1a0] sm:$0xff]  ;;  %v2887_v59 = vld [vmem:[#allocation7 + $0x1a8] sm:$0xff] }
 0x33f   :  { %1526 = vmatpush.msra.mxu3 %v2881_v16  ;;  %v2889_v60 = vld [vmem:[#allocation7 + $0x1b0] sm:$0xff]  ;;  %1487 = vmatpush.msra.mxu1 %v2887_v59 }
 0x340   :  { %v1892_v3 = vmul.f32 -1.442695, %v1097_v61  ;;  %v1893_v4 = vmul.f32 -1.442695, %v1098_v0  ;;  %v2893_v61 = vld [vmem:[#allocation7 + $0x1b8] sm:$0xff]  ;;  %1507 = vmatpush.msra.mxu2 %v2889_v60  ;;  %v2897_v0 = vld [vmem:[#allocation7 + $0x180] sm:$0xff] }
 0x341   :  { %1527 = vmatpush.msra.mxu3 %v2893_v61 }
 0x342   :  { %1977 = vpow2.f32 %v1892_v3  ;;  %v2899_v3 = vld [vmem:[#allocation7 + $0x188] sm:$0xff] }
 0x343   :  { %1979 = vpow2.f32 %v1893_v4  ;;  %v2901_v4 = vld [vmem:[#allocation7 + $0x190] sm:$0xff]  ;;  %1488 = vmatpush.msra.mxu1 %v2899_v3 }
 0x344   :  { %v1094_v6 = vpop.f32.mrf.mxu3  ;;  %v1074_v20 = vpop.f32.mrf.mxu2  ;;  %1508 = vmatpush.msra.mxu2 %v2901_v4 }
 0x345   :  { %v1100_v7 = vadd.f32 %v1094_v6, %v952_v5  ;;  %v1099_v27 = vadd.f32 %v1074_v20, %v951_v19  ;;  %v2905_v5 = vld [vmem:[#allocation7 + $0x198] sm:$0xff]  ;;  %v2909_v6 = vld [vmem:[#allocation7 + $0x160] sm:$0xff] }
 0x346   :  { %1528 = vmatpush.msra.mxu3 %v2905_v5  ;;  %v2929_v19 = vld [vmem:[#allocation7 + $0x158] sm:$0xff]  ;;  %v2933_v20 = vld [vmem:[#allocation7 + $0x120] sm:$0xff] }
 0x347   :  { %v1894_v12 = vmul.f32 -1.442695, %v1100_v7  ;;  %v2911_v7 = vld [vmem:[#allocation7 + $0x168] sm:$0xff] }
 0x348   :  { %v1978_v13 = vpop.eup %1977  ;;  %1489 = vmatpush.msra.mxu1 %v2911_v7 }
 0x349   :  { %v1980_v14 = vpop.eup %1979  ;;  %v1107_v15 = vadd.f32 1.0, %v1978_v13  ;;  %1981 = vpow2.f32 %v1894_v12  ;;  %v2913_v12 = vld [vmem:[#allocation7 + $0x170] sm:$0xff]  ;;  %v2917_v13 = vld [vmem:[#allocation7 + $0x178] sm:$0xff] }
 0x34a   :  { %v1108_v17 = vadd.f32 1.0, %v1980_v14  ;;  %1509 = vmatpush.msra.mxu2 %v2913_v12  ;;  %1529 = vmatpush.msra.mxu3 %v2917_v13  ;;  %v2921_v14 = vld [vmem:[#allocation7 + $0x140] sm:$0xff] }
 0x34b   :  { %1983 = vrcp.f32 %v1107_v15  ;;  %v1120_v35 = vand.u32 2147483648, %v1107_v15  ;;  %v1118_v42 = vand.u32 2147483647, %v1107_v15  ;;  %vm1114_vm2 = vweird.f32 %v1107_v15 }
 0x34c   :  { %1985 = vrcp.f32 %v1108_v17  ;;  %v1135_v38 = vand.u32 2147483648, %v1108_v17  ;;  %v1133_v49 = vand.u32 2147483647, %v1108_v17  ;;  %vm1129_vm3 = vweird.f32 %v1108_v17  ;;  %1530 = vmatpush.msra.mxu3 %v2929_v19 }
 0x34d   :  { %v1121_v36 = vor.u32 1.1754944e-38, %v1120_v35  ;;  %vm1119_vm6 = vcmp.eq.f32.partialorder %v1118_v42, 8.507059e+37  ;;  %v2961_v35 = vld [vmem:[#allocation7 + $0xf0] sm:$0xff]  ;;  %v2971_v42 = vld [vmem:[#allocation7 + $0xc8] sm:$0xff] }
 0x34e   :  { %v1136_v62 = vor.u32 1.1754944e-38, %v1135_v38  ;;  %vm1134_vm7 = vcmp.eq.f32.partialorder %v1133_v49, 8.507059e+37  ;;  %v2965_v38 = vld [vmem:[#allocation7 + $0xf8] sm:$0xff] }
 0x34f   :  { %v1982_v23 = vpop.eup %1981  ;;  %v2977_v49 = vld [vmem:[#allocation7 + $0xd8] sm:$0xff] }
 0x350   :  { %v1143_v25 = vadd.f32 1.0, %v1982_v23  ;;  %v2935_v23 = vld [vmem:[#allocation7 + $0x128] sm:$0xff] }
 0x351   :  { %v1984_v26 = vpop.eup %1983 }
 0x352   :  { %v1986_v28 = vpop.eup %1985  ;;  %v1110_v29 = vmul.f32 %v1984_v26, %v1107_v15  ;;  %1987 = vrcp.f32 %v1143_v25  ;;  %vm1115_vm0 = vweird.f32 %v1984_v26  ;;  %v1155_v21 = vand.u32 2147483648, %v1143_v25  ;;  %v2923_v15 = vld [vmem:[#allocation7 + $0x148] sm:$0xff] }
 0x353   :  { %v1125_v32 = vmul.f32 %v1986_v28, %v1108_v17  ;;  %1989 = vtanh.f32 %v1099_v27  ;;  %vm1130_vm1 = vweird.f32 %v1986_v28  ;;  %vm1116_vm4 = vmor %vm1114_vm2, %vm1115_vm0  ;;  %v1153_v24 = vand.u32 2147483647, %v1143_v25  ;;  %v2925_v17 = vld [vmem:[#allocation7 + $0x150] sm:$0xff]  ;;  %1490 = vmatpush.msra.mxu1 %v2923_v15  ;;  %v2945_v27 = vld [vmem:[#allocation7 + $0x100] sm:$0xff] }
 0x354   :  { %v1111_v33 = vsub.f32 1.0, %v1110_v29  ;;  %vm1131_vm5 = vmor %vm1129_vm3, %vm1130_vm1  ;;  %1991 = vtanh.f32 %v2853_v51  ;;  %vm1149_vm9 = vweird.f32 %v1143_v25  ;;  %v1156_v37 = vor.u32 1.1754944e-38, %v1155_v21  ;;  %1510 = vmatpush.msra.mxu2 %v2925_v17  ;;  %v2949_v29 = vld [vmem:[#allocation7 + $0x110] sm:$0xff] }
 0x355   :  { %v1126_v34 = vsub.f32 1.0, %v1125_v32  ;;  %vm1154_vm11 = vcmp.eq.f32.partialorder %v1153_v24, 8.507059e+37  ;;  %1491 = vmatpush.msra.mxu1 %v2935_v23  ;;  %v2953_v32 = vld [vmem:[#allocation7 + $0x118] sm:$0xff]  ;;  %v3009_v24 = vld [vmem:[#allocation7 + $0x70] sm:$0xff] }
 0x356   :  { %v1112_v41 = vmul.f32 %v1984_v26, %v1111_v33  ;;  %v2957_v33 = vld [vmem:[#allocation7 + $0xe0] sm:$0xff] }
 0x357   :  { %v1127_v43 = vmul.f32 %v1986_v28, %v1126_v34  ;;  %v2959_v34 = vld [vmem:[#allocation7 + $0xe8] sm:$0xff] }
 0x358   :  { %v1988_v50 = vpop.eup %1987  ;;  %v1113_v31 = vadd.f32 %v1984_v26, %v1112_v41  ;;  %v2969_v41 = vld [vmem:[#allocation7 + $0xc0] sm:$0xff] }
 0x359   :  { %v1128_v39 = vadd.f32 %v1986_v28, %v1127_v43  ;;  %v1145_v46 = vmul.f32 %v1988_v50, %v1143_v25  ;;  %v1990_v63 = vpop.eup %1989  ;;  %vm1150_vm8 = vweird.f32 %v1988_v50  ;;  %v2937_v25 = vld [vmem:[#allocation7 + $0x130] sm:$0xff] }
 0x35a   :  { %v1117_v2 = vsel %vm1116_vm4, %v1984_v26, %v1113_v31  ;;  %vm1151_vm10 = vmor %vm1149_vm9, %vm1150_vm8  ;;  %v1992_v48 = vpop.eup %1991  ;;  %v2941_v26 = vld [vmem:[#allocation7 + $0x138] sm:$0xff]  ;;  %1511 = vmatpush.msra.mxu2 %v2937_v25  ;;  %v2973_v43 = vld [vmem:[#allocation7 + $0xd0] sm:$0xff] }
 0x35b   :  { %v1122_v10 = vsel %vm1119_vm6, %v1121_v36, %v1117_v2  ;;  %v1132_v11 = vsel %vm1131_vm5, %v1986_v28, %v1128_v39  ;;  %v1146_v1 = vsub.f32 1.0, %v1145_v46  ;;  %1531 = vmatpush.msra.mxu3 %v2941_v26  ;;  %v2947_v28 = vld [vmem:[#allocation7 + $0x108] sm:$0xff]  ;;  %v2985_v36 = vld [vmem:[#allocation7 + $0xb0] sm:$0xff]  ;;  %v1173_v39 = vld [vmem:[#allocation4 + $0xa0] sm:$0xff] }
 0x35c   :  { %v1137_v18 = vsel %vm1134_vm7, %v1136_v62, %v1132_v11  ;;  %v1160_v44 = vmul.f32 %v1990_v63, %v1122_v10  ;;  %1492 = vmatpush.msra.mxu1 %v2947_v28  ;;  %1512 = vmatpush.msra.mxu2 %v2949_v29  ;;  %v2983_v31 = vld [vmem:[#allocation7 + $0xa8] sm:$0xff]  ;;  %v2989_v62 = vld [vmem:[#allocation7 + $0xb8] sm:$0xff]  ;;  %v2993_v2 = vld [vmem:[#allocation7 + $0x80] sm:$0xff] }
 0x35d   :  { %v1159_v22 = vmul.f32 %v1137_v18, %v2853_v51  ;;  %v1147_v40 = vmul.f32 %v1988_v50, %v1146_v1  ;;  %v2861_v51 = vld [vmem:[#allocation7 + $0x1e0] sm:$0xff]  ;;  %1532 = vmatpush.msra.mxu3 %v2953_v32  ;;  %v1174_v46 = vld [vmem:[#allocation4 + $0xa8] sm:$0xff]  ;;  %v2997_v10 = vld [vmem:[#allocation7 + $0x90] sm:$0xff] }
 0x35e   :  { %1465 = vmatpush.msra.mxu0 %v2861_v51  ;;  %1493 = vmatpush.msra.mxu1 %v2959_v34  ;;  %v2995_v63 = vld [vmem:[#allocation7 + $0x88] sm:$0xff]  ;;  %v3001_v18 = vld [vmem:[#allocation7 + $0x98] sm:$0xff] }
 0x35f   :  { %v2858_v47 = vadd.f32 %v1160_v44, %v1159_v22  ;;  %v1148_v45 = vadd.f32 %v1988_v50, %v1147_v40  ;;  %1513 = vmatpush.msra.mxu2 %v2961_v35  ;;  %1533 = vmatpush.msra.mxu3 %v2965_v38  ;;  %v3005_v22 = vld [vmem:[#allocation7 + $0x60] sm:$0xff]  ;;  %v3007_v40 = vld [vmem:[#allocation7 + $0x68] sm:$0xff] }
 0x360   :  { %1466 = vmatpush.msra.mxu0 %v2873_v55  ;;  %1494 = vmatpush.msra.mxu1 %v2971_v42 }
 0x361   :  { %1169 = vst [vmem:[#allocation10 + $0x20] sm:$0xff] %v2858_v47  ;;  %v1152_v9 = vsel %vm1151_vm10, %v1988_v50, %v1148_v45  ;;  %1514 = vmatpush.msra.mxu2 %v2973_v43  ;;  %1534 = vmatpush.msra.mxu3 %v2977_v49  ;;  %v2981_v50 = vld [vmem:[#allocation7 + $0xa0] sm:$0xff]  ;;  %v3013_v45 = vld [vmem:[#allocation7 + $0x78] sm:$0xff] }
 0x362   :  { %v1157_v30 = vsel %vm1154_vm11, %v1156_v37, %v1152_v9  ;;  %1467 = vmatpush.msra.mxu0 %v2885_v58  ;;  %1495 = vmatpush.msra.mxu1 %v2983_v31  ;;  %3236 = vst [vmem:[#allocation29_spill] sm:$0xff] %v3013_v45 }
 0x363   :  { %v1163_v8 = vmul.f32 %v1992_v48, %v1157_v30  ;;  %1515 = vmatpush.msra.mxu2 %v2985_v36  ;;  %1535 = vmatpush.msra.mxu3 %v2989_v62  ;;  %v1176_v48 = vld [vmem:[#allocation4 + $0xb8] sm:$0xff]  ;;  %v3017_v30 = vld [vmem:[#allocation7 + $0x40] sm:$0xff] }
 0x364   :  { %1468 = vmatpush.msra.mxu0 %v2897_v0  ;;  %1496 = vmatpush.msra.mxu1 %v2995_v63  ;;  %3237 = vst [vmem:[#allocation30_spill] sm:$0xff] %v3017_v30 }
 0x365   :  { %1167 = vst [vmem:[#allocation9 + $0x20] sm:$0xff] %v1163_v8  ;;  %1257 = vmatmul.f32.vlgmr.msrb.gmra.mxu0 %v1163_v8  ;;  %1277 = vmatmul.f32.vlgmr.msrb.gmra.mxu1 %v1163_v8 }
 0x366   :  { %1297 = vmatmul.f32.vlgmr.msrb.gmra.mxu2 %v1163_v8  ;;  %1317 = vmatmul.f32.vlgmr.msrb.gmra.mxu3 %v1163_v8  ;;  %v3019_v8 = vld [vmem:[#allocation7 + $0x48] sm:$0xff] }
 0x367   :  { %1469 = vmatpush.msra.mxu0 %v2909_v6  ;;  %1516 = vmatpush.msra.mxu2 %v2997_v10  ;;  %3238 = vst [vmem:[#allocation31_spill] sm:$0xff] %v3019_v8 }
 0x368   :  { %1536 = vmatpush.msra.mxu3 %v3001_v18  ;;  %1497 = vmatpush.msra.mxu1 %v3007_v40 }
 0x369   :  { %1470 = vmatpush.msra.mxu0 %v2921_v14  ;;  %1517 = vmatpush.msra.mxu2 %v3009_v24 }
 0x36a   :  { %1537 = vmatpush.msra.mxu3 %v3013_v45  ;;  %1498 = vmatpush.msra.mxu1 %v3019_v8  ;;  %v3039_v8 = vld [vmem:[#allocation7] sm:$0xff] }
 0x36b   :  { %1471 = vmatpush.msra.mxu0 %v2933_v20 }
 0x36d   :  { %1472 = vmatpush.msra.mxu0 %v2945_v27 }
 0x36f   :  { %1473 = vmatpush.msra.mxu0 %v2957_v33 }
 0x371   :  { %1474 = vmatpush.msra.mxu0 %v2969_v41 }
 0x373   :  { %1475 = vmatpush.msra.mxu0 %v2981_v50 }
 0x375   :  { %1476 = vmatpush.msra.mxu0 %v2993_v2 }
 0x377   :  { %1477 = vmatpush.msra.mxu0 %v3005_v22 }
 0x379   :  { %1478 = vmatpush.msra.mxu0 %v3017_v30  ;;  %v3041_v30 = vld [vmem:[#allocation7 + $0x8] sm:$0xff] }
 0x3e2   :  { %v1258_v11 = vpop.f32.mrf.mxu0  ;;  %v1278_v1 = vpop.f32.mrf.mxu1 }
 0x3e3   :  { %v1321_v44 = vadd.f32 %v1258_v11, %v1173_v39  ;;  %v1322_v21 = vadd.f32 %v1278_v1, %v1174_v46  ;;  %v3023_v39 = vld [vmem:[#allocation7 + $0x50] sm:$0xff]  ;;  %v3025_v46 = vld [vmem:[#allocation7 + $0x58] sm:$0xff]  ;;  %v3027_v11 = vld [vmem:[#allocation7 + $0x20] sm:$0xff] }
 0x3e4   :  { %3239 = vst [vmem:[#allocation32_spill] sm:$0xff] %v3023_v39  ;;  %1518 = vmatpush.msra.mxu2 %v3023_v39  ;;  %1538 = vmatpush.msra.mxu3 %v3025_v46  ;;  %v3031_v1 = vld [vmem:[#allocation7 + $0x28] sm:$0xff] }
 0x3e5   :  { %v1895_v37 = vmul.f32 -1.442695, %v1321_v44  ;;  %v1896_v9 = vmul.f32 -1.442695, %v1322_v21  ;;  %3240 = vst [vmem:[#allocation33_spill] sm:$0xff] %v3025_v46  ;;  %v3033_v44 = vld [vmem:[#allocation7 + $0x30] sm:$0xff]  ;;  %1479 = vmatpush.msra.mxu0 %v3027_v11  ;;  %1499 = vmatpush.msra.mxu1 %v3031_v1 }
 0x3e6   :  { %3241 = vst [vmem:[#allocation34_spill] sm:$0xff] %v3031_v1  ;;  %v3035_v21 = vld [vmem:[#allocation7 + $0x38] sm:$0xff]  ;;  %1519 = vmatpush.msra.mxu2 %v3033_v44 }
 0x3e7   :  { %1993 = vpow2.f32 %v1895_v37  ;;  %3242 = vst [vmem:[#allocation35_spill] sm:$0xff] %v3035_v21  ;;  %v3043_v37 = vld [vmem:[#allocation7 + $0x10] sm:$0xff]  ;;  %1539 = vmatpush.msra.mxu3 %v3035_v21  ;;  %v3047_v46 = vld [vmem:[#allocation7 + $0x18] sm:$0xff]  ;;  %1480 = vmatpush.msra.mxu0 %v3039_v8 }
 0x3e8   :  { %1995 = vpow2.f32 %v1896_v9  ;;  %1500 = vmatpush.msra.mxu1 %v3041_v30  ;;  %1520 = vmatpush.msra.mxu2 %v3043_v37 }
 0x3e9   :  { %v1318_v39 = vpop.f32.mrf.mxu3  ;;  %1540 = vmatpush.msra.mxu3 %v3047_v46  ;;  %1689 = vmatpush.msrb.mxu0 %v2861_v51  ;;  %v1175_v51 = vld [vmem:[#allocation4 + $0xb0] sm:$0xff] }
 0x3ea   :  { %v1324_v45 = vadd.f32 %v1318_v39, %v1176_v48  ;;  %1709 = vmatpush.msrb.mxu1 %v2863_v52  ;;  %1729 = vmatpush.msrb.mxu2 %v2865_v53  ;;  %v1298_v52 = vpop.f32.mrf.mxu2 }
 0x3eb   :  { %1749 = vmatpush.msrb.mxu3 %v2869_v54  ;;  %1690 = vmatpush.msrb.mxu0 %v2873_v55 }
 0x3ec   :  { %v1897_v9 = vmul.f32 -1.442695, %v1324_v45  ;;  %1710 = vmatpush.msrb.mxu1 %v2875_v56  ;;  %1730 = vmatpush.msrb.mxu2 %v2877_v57  ;;  %v1323_v56 = vadd.f32 %v1298_v52, %v1175_v51 }
 0x3ed   :  { %v1994_v1 = vpop.eup %1993  ;;  %1750 = vmatpush.msrb.mxu3 %v2881_v16  ;;  %1691 = vmatpush.msrb.mxu0 %v2885_v58 }
 0x3ee   :  { %v1996_v21 = vpop.eup %1995  ;;  %v3057_v48 = vadd.f32 1.0, %v1994_v1  ;;  %1997 = vpow2.f32 %v1897_v9  ;;  %1711 = vmatpush.msrb.mxu1 %v2887_v59  ;;  %1731 = vmatpush.msrb.mxu2 %v2889_v60 }
 0x3ef   :  { %v3061_v39 = vadd.f32 1.0, %v1996_v21  ;;  %1751 = vmatpush.msrb.mxu3 %v2893_v61  ;;  %1692 = vmatpush.msrb.mxu0 %v2897_v0  ;;  %v1400_v21 = vld [vmem:[#allocation4 + $0xd8] sm:$0xff] }
 0x3f0   :  { %1999 = vrcp.f32 %v3057_v48  ;;  %1712 = vmatpush.msrb.mxu1 %v2899_v3  ;;  %1732 = vmatpush.msrb.mxu2 %v2901_v4  ;;  %v1344_v61 = vand.u32 2147483648, %v3057_v48  ;;  %v1342_v4 = vand.u32 2147483647, %v3057_v48  ;;  %vm1338_vm14 = vweird.f32 %v3057_v48 }
 0x3f1   :  { %2001 = vrcp.f32 %v3061_v39  ;;  %1752 = vmatpush.msrb.mxu3 %v2905_v5  ;;  %1693 = vmatpush.msrb.mxu0 %v2909_v6  ;;  %v1359_v0 = vand.u32 2147483648, %v3061_v39  ;;  %v1357_v6 = vand.u32 2147483647, %v3061_v39  ;;  %vm1353_vm15 = vweird.f32 %v3061_v39 }
 0x3f2   :  { %1713 = vmatpush.msrb.mxu1 %v2911_v7  ;;  %1733 = vmatpush.msrb.mxu2 %v2913_v12  ;;  %vm1343_vm2 = vcmp.eq.f32.partialorder %v1342_v4, 8.507059e+37 }
 0x3f3   :  { %1753 = vmatpush.msrb.mxu3 %v2917_v13  ;;  %1694 = vmatpush.msrb.mxu0 %v2921_v14  ;;  %v1345_v13 = vor.u32 1.1754944e-38, %v1344_v61  ;;  %vm1358_vm3 = vcmp.eq.f32.partialorder %v1357_v6, 8.507059e+37 }
 0x3f4   :  { %v1998_v53 = vpop.eup %1997  ;;  %1714 = vmatpush.msrb.mxu1 %v2923_v15  ;;  %1734 = vmatpush.msrb.mxu2 %v2925_v17  ;;  %v1360_v17 = vor.u32 1.1754944e-38, %v1359_v0 }
 0x3f5   :  { %v3077_v54 = vadd.f32 1.0, %v1998_v53  ;;  %1754 = vmatpush.msrb.mxu3 %v2929_v19  ;;  %1695 = vmatpush.msrb.mxu0 %v2933_v20 }
 0x3f6   :  { %v2000_v55 = vpop.eup %1999  ;;  %1715 = vmatpush.msrb.mxu1 %v2935_v23  ;;  %1735 = vmatpush.msrb.mxu2 %v2937_v25 }
 0x3f7   :  { %v2002_v57 = vpop.eup %2001  ;;  %v1334_v16 = vmul.f32 %v2000_v55, %v3057_v48  ;;  %2003 = vrcp.f32 %v3077_v54  ;;  %1755 = vmatpush.msrb.mxu3 %v2941_v26  ;;  %1696 = vmatpush.msrb.mxu0 %v2945_v27  ;;  %vm1339_vm12 = vweird.f32 %v2000_v55  ;;  %vm1373_vm5 = vweird.f32 %v3077_v54 }
 0x3f8   :  { %v1349_v58 = vmul.f32 %v2002_v57, %v3061_v39  ;;  %2005 = vtanh.f32 %v1323_v56  ;;  %1716 = vmatpush.msrb.mxu1 %v2947_v28  ;;  %1736 = vmatpush.msrb.mxu2 %v2949_v29  ;;  %vm1354_vm13 = vweird.f32 %v2002_v57  ;;  %vm1340_vm0 = vmor %vm1338_vm14, %vm1339_vm12  ;;  %v1379_v29 = vand.u32 2147483648, %v3077_v54 }
 0x3f9   :  { %v1335_v59 = vsub.f32 1.0, %v1334_v16  ;;  %1756 = vmatpush.msrb.mxu3 %v2953_v32  ;;  %1697 = vmatpush.msrb.mxu0 %v2957_v33  ;;  %vm1355_vm1 = vmor %vm1353_vm15, %vm1354_vm13  ;;  %2007 = vtanh.f32 %v2858_v47 }
 0x3fa   :  { %v1350_v60 = vsub.f32 1.0, %v1349_v58  ;;  %1717 = vmatpush.msrb.mxu1 %v2959_v34  ;;  %1737 = vmatpush.msrb.mxu2 %v2961_v35  ;;  %v1377_v34 = vand.u32 2147483647, %v3077_v54 }
 0x3fb   :  { %v1336_v3 = vmul.f32 %v2000_v55, %v1335_v59  ;;  %1757 = vmatpush.msrb.mxu3 %v2965_v38  ;;  %1698 = vmatpush.msrb.mxu0 %v2969_v41  ;;  %v3243_v41 = vld [vmem:[#allocation29_spill] sm:$0xff] }
 0x3fc   :  { %v1351_v5 = vmul.f32 %v2002_v57, %v1350_v60  ;;  %1718 = vmatpush.msrb.mxu1 %v2971_v42  ;;  %1738 = vmatpush.msrb.mxu2 %v2973_v43  ;;  %vm1378_vm7 = vcmp.eq.f32.partialorder %v1377_v34, 8.507059e+37  ;;  %v3244_v43 = vld [vmem:[#allocation30_spill] sm:$0xff] }
 0x3fd   :  { %v2004_v7 = vpop.eup %2003  ;;  %v1337_v12 = vadd.f32 %v2000_v55, %v1336_v3  ;;  %1758 = vmatpush.msrb.mxu3 %v2977_v49  ;;  %1699 = vmatpush.msrb.mxu0 %v2981_v50  ;;  %v3245_v49 = vld [vmem:[#allocation31_spill] sm:$0xff] }
 0x3fe   :  { %v1352_v14 = vadd.f32 %v2002_v57, %v1351_v5  ;;  %v1369_v15 = vmul.f32 %v2004_v7, %v3077_v54  ;;  %v2006_v20 = vpop.eup %2005  ;;  %1719 = vmatpush.msrb.mxu1 %v2983_v31  ;;  %1739 = vmatpush.msrb.mxu2 %v2985_v36  ;;  %vm1374_vm4 = vweird.f32 %v2004_v7  ;;  %v3246_v36 = vld [vmem:[#allocation32_spill] sm:$0xff] }
 0x3ff   :  { %v1341_v19 = vsel %vm1340_vm0, %v2000_v55, %v1337_v12  ;;  %1759 = vmatpush.msrb.mxu3 %v2989_v62  ;;  %1700 = vmatpush.msrb.mxu0 %v2993_v2  ;;  %vm1375_vm6 = vmor %vm1373_vm5, %vm1374_vm4  ;;  %v2008_v50 = vpop.eup %2007  ;;  %v3247_v62 = vld [vmem:[#allocation33_spill] sm:$0xff] }
 0x400   :  { %v1346_v23 = vsel %vm1343_vm2, %v1345_v13, %v1341_v19  ;;  %v1356_v25 = vsel %vm1355_vm1, %v2002_v57, %v1352_v14  ;;  %v1370_v26 = vsub.f32 1.0, %v1369_v15  ;;  %1720 = vmatpush.msrb.mxu1 %v2995_v63  ;;  %1740 = vmatpush.msrb.mxu2 %v2997_v10  ;;  %v3248_v63 = vld [vmem:[#allocation34_spill] sm:$0xff]  ;;  %v3249_v10 = vld [vmem:[#allocation35_spill] sm:$0xff] }
 0x401   :  { %v1361_v27 = vsel %vm1358_vm3, %v1360_v17, %v1356_v25  ;;  %v1384_v28 = vmul.f32 %v2006_v20, %v1346_v23  ;;  %1760 = vmatpush.msrb.mxu3 %v3001_v18  ;;  %1701 = vmatpush.msrb.mxu0 %v3005_v22  ;;  %v1397_v18 = vld [vmem:[#allocation4 + $0xc0] sm:$0xff]  ;;  %v1398_v22 = vld [vmem:[#allocation4 + $0xc8] sm:$0xff] }
 0x402   :  { %v1383_v32 = vmul.f32 %v1361_v27, %v2858_v47  ;;  %v1371_v33 = vmul.f32 %v2004_v7, %v1370_v26  ;;  %1721 = vmatpush.msrb.mxu1 %v3007_v40  ;;  %v1380_v47 = vor.u32 1.1754944e-38, %v1379_v29  ;;  %1741 = vmatpush.msrb.mxu2 %v3009_v24 }
 0x403   :  { %1761 = vmatpush.msrb.mxu3 %v3243_v41  ;;  %1702 = vmatpush.msrb.mxu0 %v3244_v43 }
 0x404   :  { %v3125_v35 = vadd.f32 %v1384_v28, %v1383_v32  ;;  %v1372_v38 = vadd.f32 %v2004_v7, %v1371_v33  ;;  %1722 = vmatpush.msrb.mxu1 %v3245_v49  ;;  %1742 = vmatpush.msrb.mxu2 %v3246_v36 }
 0x405   :  { %1762 = vmatpush.msrb.mxu3 %v3247_v62  ;;  %1703 = vmatpush.msrb.mxu0 %v3027_v11 }
 0x406   :  { %1393 = vst [vmem:[#allocation10 + $0x28] sm:$0xff] %v3125_v35  ;;  %v1376_v42 = vsel %vm1375_vm6, %v2004_v7, %v1372_v38  ;;  %1723 = vmatpush.msrb.mxu1 %v3248_v63  ;;  %1743 = vmatpush.msrb.mxu2 %v3033_v44 }
 0x407   :  { %v1381_v31 = vsel %vm1378_vm7, %v1380_v47, %v1376_v42  ;;  %1763 = vmatpush.msrb.mxu3 %v3249_v10  ;;  %1704 = vmatpush.msrb.mxu0 %v3039_v8 }
 0x408   :  { %v1387_v2 = vmul.f32 %v2008_v50, %v1381_v31  ;;  %1724 = vmatpush.msrb.mxu1 %v3041_v30  ;;  %1744 = vmatpush.msrb.mxu2 %v3043_v37  ;;  %v1622_v31 = vld [vmem:[#allocation4 + $0xe8] sm:$0xff] }
 0x409   :  { %1764 = vmatpush.msrb.mxu3 %v3047_v46  ;;  %v1399_v46 = vld [vmem:[#allocation4 + $0xd0] sm:$0xff] }
 0x40a   :  { %1391 = vst [vmem:[#allocation9 + $0x28] sm:$0xff] %v1387_v2  ;;  %1481 = vmatmul.f32.vlgmr.msra.gmra.mxu0 %v1387_v2  ;;  %1501 = vmatmul.f32.vlgmr.msra.gmra.mxu1 %v1387_v2 }
 0x40b   :  { %1521 = vmatmul.f32.vlgmr.msra.gmra.mxu2 %v1387_v2  ;;  %1541 = vmatmul.f32.vlgmr.msra.gmra.mxu3 %v1387_v2 }
 0x487   :  { %v1482_v40 = vpop.f32.mrf.mxu0  ;;  %v1502_v24 = vpop.f32.mrf.mxu1 }
 0x488   :  { %v1545_v45 = vadd.f32 %v1482_v40, %v1397_v18  ;;  %v1546_v11 = vadd.f32 %v1502_v24, %v1398_v22  ;;  %v1624_v22 = vld [vmem:[#allocation4 + $0xf8] sm:$0xff] }
 0x48a   :  { %v1898_v1 = vmul.f32 -1.442695, %v1545_v45  ;;  %v1899_v44 = vmul.f32 -1.442695, %v1546_v11 }
 0x48c   :  { %2009 = vpow2.f32 %v1898_v1 }
 0x48d   :  { %2011 = vpow2.f32 %v1899_v44 }
 0x48e   :  { %v1542_v9 = vpop.f32.mrf.mxu3  ;;  %v1522_v52 = vpop.f32.mrf.mxu2 }
 0x48f   :  { %v1548_v48 = vadd.f32 %v1542_v9, %v1400_v21  ;;  %v1547_v56 = vadd.f32 %v1522_v52, %v1399_v46  ;;  %v1623_v9 = vld [vmem:[#allocation4 + $0xf0] sm:$0xff] }
 0x491   :  { %v1900_v8 = vmul.f32 -1.442695, %v1548_v48 }
 0x492   :  { %v2010_v39 = vpop.eup %2009 }
 0x493   :  { %v2012_v30 = vpop.eup %2011  ;;  %v1555_v51 = vadd.f32 1.0, %v2010_v39  ;;  %2013 = vpow2.f32 %v1900_v8 }
 0x494   :  { %v1556_v37 = vadd.f32 1.0, %v2012_v30 }
 0x495   :  { %2015 = vrcp.f32 %v1555_v51  ;;  %v1568_v61 = vand.u32 2147483648, %v1555_v51  ;;  %v1566_v4 = vand.u32 2147483647, %v1555_v51  ;;  %vm1562_vm10 = vweird.f32 %v1555_v51 }
 0x496   :  { %2017 = vrcp.f32 %v1556_v37  ;;  %v1583_v0 = vand.u32 2147483648, %v1556_v37  ;;  %v1581_v6 = vand.u32 2147483647, %v1556_v37  ;;  %vm1577_vm11 = vweird.f32 %v1556_v37 }
 0x497   :  { %v1569_v13 = vor.u32 1.1754944e-38, %v1568_v61  ;;  %vm1567_vm14 = vcmp.eq.f32.partialorder %v1566_v4, 8.507059e+37 }
 0x498   :  { %v1584_v17 = vor.u32 1.1754944e-38, %v1583_v0  ;;  %vm1582_vm15 = vcmp.eq.f32.partialorder %v1581_v6, 8.507059e+37 }
 0x499   :  { %v2014_v53 = vpop.eup %2013 }
 0x49a   :  { %v1591_v54 = vadd.f32 1.0, %v2014_v53 }
 0x49b   :  { %v2016_v55 = vpop.eup %2015 }
 0x49c   :  { %v2018_v57 = vpop.eup %2017  ;;  %v1558_v16 = vmul.f32 %v2016_v55, %v1555_v51  ;;  %2019 = vrcp.f32 %v1591_v54  ;;  %vm1563_vm8 = vweird.f32 %v2016_v55  ;;  %v1603_v29 = vand.u32 2147483648, %v1591_v54 }
 0x49d   :  { %v1573_v58 = vmul.f32 %v2018_v57, %v1556_v37  ;;  %2021 = vtanh.f32 %v1547_v56  ;;  %vm1578_vm9 = vweird.f32 %v2018_v57  ;;  %vm1564_vm12 = vmor %vm1562_vm10, %vm1563_vm8  ;;  %v1601_v34 = vand.u32 2147483647, %v1591_v54 }
 0x49e   :  { %v1559_v59 = vsub.f32 1.0, %v1558_v16  ;;  %vm1579_vm13 = vmor %vm1577_vm11, %vm1578_vm9  ;;  %2023 = vtanh.f32 %v3125_v35  ;;  %vm1597_vm1 = vweird.f32 %v1591_v54  ;;  %v1604_v41 = vor.u32 1.1754944e-38, %v1603_v29 }
 0x49f   :  { %v1574_v60 = vsub.f32 1.0, %v1573_v58  ;;  %vm1602_vm3 = vcmp.eq.f32.partialorder %v1601_v34, 8.507059e+37 }
 0x4a0   :  { %v1560_v3 = vmul.f32 %v2016_v55, %v1559_v59 }
 0x4a1   :  { %v1575_v5 = vmul.f32 %v2018_v57, %v1574_v60 }
 0x4a2   :  { %v2020_v7 = vpop.eup %2019  ;;  %v1561_v12 = vadd.f32 %v2016_v55, %v1560_v3 }
 0x4a3   :  { %v1576_v14 = vadd.f32 %v2018_v57, %v1575_v5  ;;  %v1593_v15 = vmul.f32 %v2020_v7, %v1591_v54  ;;  %v2022_v20 = vpop.eup %2021  ;;  %vm1598_vm0 = vweird.f32 %v2020_v7 }
 0x4a4   :  { %v1565_v19 = vsel %vm1564_vm12, %v2016_v55, %v1561_v12  ;;  %vm1599_vm2 = vmor %vm1597_vm1, %vm1598_vm0  ;;  %v2024_v43 = vpop.eup %2023 }
 0x4a5   :  { %v1570_v23 = vsel %vm1567_vm14, %v1569_v13, %v1565_v19  ;;  %v1580_v25 = vsel %vm1579_vm13, %v2018_v57, %v1576_v14  ;;  %v1594_v26 = vsub.f32 1.0, %v1593_v15 }
 0x4a6   :  { %v1585_v27 = vsel %vm1582_vm15, %v1584_v17, %v1580_v25  ;;  %v1608_v28 = vmul.f32 %v2022_v20, %v1570_v23 }
 0x4a7   :  { %v1607_v32 = vmul.f32 %v1585_v27, %v3125_v35  ;;  %v1595_v33 = vmul.f32 %v2020_v7, %v1594_v26  ;;  %v1621_v35 = vld [vmem:[#allocation4 + $0xe0] sm:$0xff] }
 0x4a9   :  { %v3147_v38 = vadd.f32 %v1608_v28, %v1607_v32  ;;  %v1596_v47 = vadd.f32 %v2020_v7, %v1595_v33 }
 0x4ab   :  { %1617 = vst [vmem:[#allocation10 + $0x30] sm:$0xff] %v3147_v38  ;;  %v1600_v42 = vsel %vm1599_vm2, %v2020_v7, %v1596_v47 }
 0x4ac   :  { %v1605_v49 = vsel %vm1602_vm3, %v1604_v41, %v1600_v42 }
 0x4ad   :  { %v1611_v50 = vmul.f32 %v2024_v43, %v1605_v49 }
 0x4af   :  { %1615 = vst [vmem:[#allocation9 + $0x30] sm:$0xff] %v1611_v50  ;;  %1705 = vmatmul.f32.vlgmr.msrb.gmra.mxu0 %v1611_v50  ;;  %1725 = vmatmul.f32.vlgmr.msrb.gmra.mxu1 %v1611_v50 }
 0x4b0   :  { %1745 = vmatmul.f32.vlgmr.msrb.gmra.mxu2 %v1611_v50  ;;  %1765 = vmatmul.f32.vlgmr.msrb.gmra.mxu3 %v1611_v50 }
 0x52c   :  { %v1706_v36 = vpop.f32.mrf.mxu0  ;;  %v1726_v62 = vpop.f32.mrf.mxu1 }
 0x52d   :  { %v1769_v2 = vadd.f32 %v1706_v36, %v1621_v35  ;;  %v1770_v63 = vadd.f32 %v1726_v62, %v1622_v31 }
 0x52f   :  { %v1901_v10 = vmul.f32 -1.442695, %v1769_v2  ;;  %v1902_v18 = vmul.f32 -1.442695, %v1770_v63 }
 0x531   :  { %2025 = vpow2.f32 %v1901_v10 }
 0x532   :  { %2027 = vpow2.f32 %v1902_v18 }
 0x533   :  { %v1766_v40 = vpop.f32.mrf.mxu3  ;;  %v1746_v48 = vpop.f32.mrf.mxu2 }
 0x534   :  { %v1772_v24 = vadd.f32 %v1766_v40, %v1624_v22  ;;  %v1771_v51 = vadd.f32 %v1746_v48, %v1623_v9 }
 0x536   :  { %v1903_v45 = vmul.f32 -1.442695, %v1772_v24 }
 0x537   :  { %v2026_v11 = vpop.eup %2025 }
 0x538   :  { %v2028_v1 = vpop.eup %2027  ;;  %v1779_v44 = vadd.f32 1.0, %v2026_v11  ;;  %2029 = vpow2.f32 %v1903_v45 }
 0x539   :  { %v1780_v21 = vadd.f32 1.0, %v2028_v1 }
 0x53a   :  { %2031 = vrcp.f32 %v1779_v44  ;;  %v1792_v55 = vand.u32 2147483648, %v1779_v44  ;;  %v1790_v16 = vand.u32 2147483647, %v1779_v44  ;;  %vm1786_vm6 = vweird.f32 %v1779_v44 }
 0x53b   :  { %2033 = vrcp.f32 %v1780_v21  ;;  %v1807_v56 = vand.u32 2147483648, %v1780_v21  ;;  %v1805_v59 = vand.u32 2147483647, %v1780_v21  ;;  %vm1801_vm7 = vweird.f32 %v1780_v21 }
 0x53c   :  { %v1793_v0 = vor.u32 1.1754944e-38, %v1792_v55  ;;  %vm1791_vm10 = vcmp.eq.f32.partialorder %v1790_v16, 8.507059e+37 }
 0x53d   :  { %v1808_v5 = vor.u32 1.1754944e-38, %v1807_v56  ;;  %vm1806_vm11 = vcmp.eq.f32.partialorder %v1805_v59, 8.507059e+37 }
 0x53e   :  { %v2030_v8 = vpop.eup %2029 }
 0x53f   :  { %v1815_v39 = vadd.f32 1.0, %v2030_v8 }
 0x540   :  { %v2032_v30 = vpop.eup %2031 }
 0x541   :  { %v2034_v37 = vpop.eup %2033  ;;  %v1782_v46 = vmul.f32 %v2032_v30, %v1779_v44  ;;  %2035 = vrcp.f32 %v1815_v39  ;;  %vm1787_vm4 = vweird.f32 %v2032_v30  ;;  %v1827_v19 = vand.u32 2147483648, %v1815_v39 }
 0x542   :  { %v1797_v52 = vmul.f32 %v2034_v37, %v1780_v21  ;;  %2037 = vtanh.f32 %v1771_v51  ;;  %vm1802_vm5 = vweird.f32 %v2034_v37  ;;  %vm1788_vm8 = vmor %vm1786_vm6, %vm1787_vm4  ;;  %v1825_v25 = vand.u32 2147483647, %v1815_v39 }
 0x543   :  { %v1783_v53 = vsub.f32 1.0, %v1782_v46  ;;  %vm1803_vm9 = vmor %vm1801_vm7, %vm1802_vm5  ;;  %2039 = vtanh.f32 %v3147_v38  ;;  %vm1821_vm13 = vweird.f32 %v1815_v39  ;;  %v1828_v28 = vor.u32 1.1754944e-38, %v1827_v19 }
 0x544   :  { %v1798_v54 = vsub.f32 1.0, %v1797_v52  ;;  %vm1826_vm15 = vcmp.eq.f32.partialorder %v1825_v25, 8.507059e+37 }
 0x545   :  { %v1784_v57 = vmul.f32 %v2032_v30, %v1783_v53 }
 0x546   :  { %v1799_v58 = vmul.f32 %v2034_v37, %v1798_v54 }
 0x547   :  { %v2036_v60 = vpop.eup %2035  ;;  %v1785_v61 = vadd.f32 %v2032_v30, %v1784_v57 }
 0x548   :  { %v1800_v3 = vadd.f32 %v2034_v37, %v1799_v58  ;;  %v1817_v4 = vmul.f32 %v2036_v60, %v1815_v39  ;;  %v2038_v7 = vpop.eup %2037  ;;  %vm1822_vm12 = vweird.f32 %v2036_v60 }
 0x549   :  { %v1789_v6 = vsel %vm1788_vm8, %v2032_v30, %v1785_v61  ;;  %vm1823_vm14 = vmor %vm1821_vm13, %vm1822_vm12  ;;  %v2040_v32 = vpop.eup %2039 }
 0x54a   :  { %v1794_v12 = vsel %vm1791_vm10, %v1793_v0, %v1789_v6  ;;  %v1804_v13 = vsel %vm1803_vm9, %v2034_v37, %v1800_v3  ;;  %v1818_v14 = vsub.f32 1.0, %v1817_v4 }
 0x54b   :  { %v1809_v15 = vsel %vm1806_vm11, %v1808_v5, %v1804_v13  ;;  %v1832_v17 = vmul.f32 %v2038_v7, %v1794_v12 }
 0x54c   :  { %v1831_v20 = vmul.f32 %v1809_v15, %v3147_v38  ;;  %v1819_v23 = vmul.f32 %v2036_v60, %v1818_v14 }
 0x54e   :  { %v1833_v26 = vadd.f32 %v1832_v17, %v1831_v20  ;;  %v1820_v27 = vadd.f32 %v2036_v60, %v1819_v23 }
 0x550   :  { %1841 = vst [vmem:[#allocation10 + $0x38] sm:$0xff] %v1833_v26  ;;  %v1824_v29 = vsel %vm1823_vm14, %v2036_v60, %v1820_v27 }
 0x551   :  { %v1829_v33 = vsel %vm1826_vm15, %v1828_v28, %v1824_v29  ;;  %1867 = dma.vmem_to_hbm [thread:$0]  %s1860_s1, 1024, %s1862_s26, [#allocation11], %s2152_s3, %s2152_s3, %s2153_s5  }
 0x552   :  { %v1835_v34 = vmul.f32 %v2040_v32, %v1829_v33 }
 0x554   :  { %1839 = vst [vmem:[#allocation9 + $0x38] sm:$0xff] %v1835_v34 }
 0x555   :  { %1854 = dma.vmem_to_hbm [thread:$0]  %s1847_s28, 1024, %s1849_s4, [#allocation6], %s2152_s3, %s2152_s3, %s2153_s5  }
 0x556   :  { %2141 = dma.done.wait [#allocation6], 1024  }
 0x557   :  { %2142 = vsyncadd [#allocation6], 4294966272 }
 0x558   :  { %2143 = dma.done.wait [#allocation11], 1024  }
 0x559   :  { %2144 = vsyncadd [#allocation11], 4294966272 }
 0x55a   :  { %1876 = vsyncpa [#allocation5], 1 }
 0x55b   :  { %1877 = vsyncpa [#allocation8], 1 }
 0x55c   :  { %1878 = vsyncpa [#allocation6], 1 }
 0x55d   :  { %1879 = vsyncpa [#allocation11], 1 }

</bundles_post_ra>
